<compile_context>
chip_gen: v7x
topology: tpu7x:2x2x1
jax: 0.10.0
libtpu: 0.0.40
codegen_flags: <defaults>
</compile_context>

<pallas_src>
import functools

import jax
import jax.numpy as jnp
from jax.experimental import pallas as pl
from jax.experimental.pallas import tpu as pltpu

KSIZE = 21
MAX_ROW_TILE = 128      # output rows per tile (keeps the f32 accumulator in vregs)
MAX_COL_TILE = 108      # output cols per tile -> contraction TWK = TW + 20 <= 128
MAX_STACK_ROWS = 160    # cap on Sb*THK so the per-dot accumulator stays small
GROUP_CAP = 16          # stacks per grid step (static unroll bound in the kernel)


# ----------------------------------------------------------------------------
# Random mixed kernel generation (plain-JAX glue, deterministic PRNG).
# ----------------------------------------------------------------------------
def random_mixed_kernel(key,
                        kernel_size=KSIZE,
                        sigma_range=(0.6, 5.0),
                        rotation_range=(-jnp.pi, jnp.pi),
                        betag_range=(0.5, 8.0),
                        betap_range=(0.5, 8.0),
                        kernel_probs=None):
    """Port of basicsr.random_mixed_kernels (noise_range=None)."""
    if kernel_probs is None:
        kernel_probs = jnp.full((6,), 1.0 / 6.0, jnp.float32)
    ks = jax.random.split(key, 6)
    sig_x = jax.random.uniform(ks[0], (), minval=sigma_range[0], maxval=sigma_range[1])
    sig_y = jax.random.uniform(ks[1], (), minval=sigma_range[0], maxval=sigma_range[1])
    theta = jax.random.uniform(ks[2], (), minval=rotation_range[0], maxval=rotation_range[1])
    betag = jax.random.uniform(ks[3], (), minval=betag_range[0], maxval=betag_range[1])
    betap = jax.random.uniform(ks[4], (), minval=betap_range[0], maxval=betap_range[1])

    half = (kernel_size - 1) / 2.0
    ax = jnp.arange(-half, half + 1, dtype=jnp.float32)
    xx, yy = jnp.meshgrid(ax, ax)

    def quad_form(sx, sy, th):
        c, s = jnp.cos(th), jnp.sin(th)
        s00 = c * c * sx * sx + s * s * sy * sy
        s01 = c * s * (sx * sx - sy * sy)
        s11 = s * s * sx * sx + c * c * sy * sy
        det = s00 * s11 - s01 * s01
        i00, i01, i11 = s11 / det, -s01 / det, s00 / det
        return i00 * xx * xx + 2.0 * i01 * xx * yy + i11 * yy * yy

    q_iso = quad_form(sig_x, sig_x, 0.0)
    q_aniso = quad_form(sig_x, sig_y, theta)

    def norm(k):
        return k / jnp.sum(k)

    candidates = jnp.stack([
        norm(jnp.exp(-0.5 * q_iso)),                    # 'iso'
        norm(jnp.exp(-0.5 * q_aniso)),                  # 'aniso'
        norm(jnp.exp(-0.5 * q_iso ** betag)),           # 'generalized_iso'
        norm(jnp.exp(-0.5 * q_aniso ** betag)),         # 'generalized_aniso'
        norm(1.0 / (q_iso ** betap + 1.0)),             # 'plateau_iso'
        norm(1.0 / (q_aniso ** betap + 1.0)),           # 'plateau_aniso'
    ])
    idx = jax.random.choice(ks[5], 6, p=kernel_probs)
    # TODO(synk): noise_range branch of random_mixed_kernels (multiplicative uniform
    # noise on the kernel) omitted because the module defaults to None.
    return candidates[idx]


# ----------------------------------------------------------------------------
# Pallas kernel: depthwise 2-D cross-correlation via banded-Toeplitz matmuls.
# ----------------------------------------------------------------------------
def _filter2d_kernel(x_ref, toep_ref, out_ref, *, ksize):
    # x_ref   : VMEM (Bg, Mp, TWK)    bf16 stacked, reflect-padded image slabs
    # toep_ref: VMEM (K, TWK, TWout)  bf16 banded-Toeplitz tap matrices (resident)
    # out_ref : VMEM (Bg, M, TWout)   output tiles; TWout is a multiple of 128
    _, m_rows, n_cols = out_ref.shape
    out_dtype = out_ref.dtype
    for b in range(x_ref.shape[0]):            # static unroll over stacks in the block
        lhs = x_ref[b].astype(jnp.bfloat16)    # single cast (no-op for bf16 inputs)
        acc = jnp.zeros((m_rows, n_cols), jnp.float32)
        for i in range(ksize):                 # bare acc += dot chain; bf16 MXU, f32 acc
            acc = acc + jnp.dot(lhs[i:i + m_rows, :], toep_ref[i],
                                preferred_element_type=jnp.float32)
        if jnp.issubdtype(out_dtype, jnp.integer):
            # cv2.filter2D rounds + saturates for integer images.
            info = jnp.iinfo(out_dtype)
            acc = jnp.clip(jnp.round(acc), info.min, info.max)
        out_ref[b] = acc.astype(out_dtype)


# ----------------------------------------------------------------------------
# Wrapper helpers.
# ----------------------------------------------------------------------------
def _round_up(x, m):
    return (x + m - 1) // m * m


def _cdiv(a, b):
    return -(-a // b)


def _banded_toeplitz(kernel, twk, tw_valid, tw_out):
    """T[i, p, w] = kernel[i, p - w] for 0 <= p - w < K and w < tw_valid, else 0."""
    K = kernel.shape[0]
    p = jnp.arange(twk)[:, None]
    w = jnp.arange(tw_out)[None, :]
    j = p - w
    valid = (j >= 0) & (j < K) & (w < tw_valid)
    gathered = kernel.astype(jnp.float32)[:, jnp.clip(j, 0, K - 1)]   # (K, twk, tw_out)
    return jnp.where(valid[None], gathered, 0.0).astype(jnp.bfloat16)


def _vmem_budget_bytes():
    """~80% of physical per-core VMEM (v7x: 64 MiB, v5e/v6e: 128 MiB)."""
    try:
        cap = int(pltpu.get_tpu_info().vmem_capacity_bytes)
    except Exception:
        cap = 64 << 20        # conservative fallback (v7x per-core)
    return int(cap * 0.8)


def _pick_stack(ns, thk, max_rows=MAX_STACK_ROWS):
    """Slabs stacked vertically per MXU dot (folds small tiles into the M dim)."""
    sb = max(1, min(ns, max_rows // max(thk, 1)))
    while ns % sb:
        sb -= 1
    return sb


def _pick_group(g, per_stack_bytes, budget_bytes, cap=GROUP_CAP):
    """Stacks per grid step: as large as VMEM allows, preferring an even number of
    grid steps so both v7x TensorCores get balanced work."""
    limit = max(1, min(cap, g, budget_bytes // max(1, 2 * per_stack_bytes)))
    best, best_rank = 1, -1
    for d in range(1, limit + 1):
        if g % d:
            continue
        steps = g // d
        rank = 2 if (steps >= 2 and steps % 2 == 0) else (1 if steps >= 2 else 0)
        if (rank, d) > (best_rank, best):
            best, best_rank = d, rank
    return best


def filter2d(image, kernel):
    """cv2.filter2D(image, -1, kernel) for an NCHW image (same kernel per channel)."""
    N, C, H, W = image.shape
    K = int(kernel.shape[0])
    pad = K // 2
    if H <= pad or W <= pad:
        raise ValueError("BORDER_REFLECT_101 padding needs H, W > kernel_size // 2")

    NC = N * C
    nt_r = _cdiv(H, MAX_ROW_TILE)
    nt_c = _cdiv(W, MAX_COL_TILE)
    TH = _cdiv(H, nt_r)                 # <= 128 output rows per tile
    TW = _cdiv(W, nt_c)                 # <= 108 output cols per tile -> TWK <= 128
    Hg, Wg = nt_r * TH, nt_c * TW
    THK, TWK = TH + K - 1, TW + K - 1
    TWout = _round_up(TW, 128)          # lane-dense (unmasked) output stores

    # bf16 MXU operands: cast once here so padding / halo gather / kernel-input DMA
    # all move half the bytes; accumulation stays f32 inside the kernel.
    x = image.astype(jnp.bfloat16)
    # cv2 default border: BORDER_REFLECT_101 == jnp.pad mode='reflect'.
    padded = jnp.pad(x, ((0, 0), (0, 0), (pad, pad), (pad, pad)), mode="reflect")
    padded = padded.reshape(NC, H + K - 1, W + K - 1)
    # Extend to whole tiles; the extra rows/cols only feed discarded outputs.
    padded = jnp.pad(padded, ((0, 0), (0, Hg - H), (0, Wg - W)))

    if nt_r == 1 and nt_c == 1:
        slabs = padded                                               # (NC, THK, TWK)
    else:
        # TODO(synk): halo windows are materialized in HBM by this gather; a manual-DMA
        # halo pipeline (pl.ANY + make_async_copy) with a 3-D grid writing outputs in
        # place would remove this extra HBM pass for very large images.
        r_idx = jnp.arange(nt_r)[:, None] * TH + jnp.arange(THK)[None, :]
        c_idx = jnp.arange(nt_c)[:, None] * TW + jnp.arange(TWK)[None, :]
        slabs = padded[:, r_idx[:, None, :, None], c_idx[None, :, None, :]]
        slabs = slabs.reshape(NC * nt_r * nt_c, THK, TWK)

    NS = slabs.shape[0]
    # Fold small tiles into the MXU M dimension: stack Sb slabs (with halos)
    # vertically so each dot has ~128 useful rows; the 20 junk rows between stacked
    # slabs are dropped after the kernel.
    Sb = _pick_stack(NS, THK)
    G = NS // Sb
    Mp = Sb * THK                       # rows of one stacked LHS
    M = Mp - (K - 1)                    # rows produced per dot (valid + inter-slab junk)
    x_stk = slabs.reshape(G, Mp, TWK)

    toep = _banded_toeplitz(kernel, TWK, TW, TWout)                  # (K, TWK, TWout) bf16
    toep_bytes = K * TWK * TWout * 2

    vmem_budget = _vmem_budget_bytes()
    per_stack = Mp * TWK * 2 + M * TWout * image.dtype.itemsize      # bf16 in + out
    Bg = _pick_group(G, per_stack, vmem_budget - 2 * toep_bytes - (8 << 20))
    need = 2 * Bg * per_stack + 2 * toep_bytes + (8 << 20)
    vmem_limit = int(min(max(need, 32 << 20), vmem_budget))

    out = pl.pallas_call(
        functools.partial(_filter2d_kernel, ksize=K),
        out_shape=jax.ShapeDtypeStruct((G, M, TWout), image.dtype),
        grid=(G // Bg,),
        in_specs=[
            pl.BlockSpec((Bg, Mp, TWK), lambda s: (s, 0, 0)),        # stacked image slabs
            # Constant index_map: fetched once and kept resident.  The bf16 Toeplitz is
            # small (<1 MiB), so its default double buffer is negligible and
            # pipeline_mode=pl.Buffered(1) is unnecessary.
            pl.BlockSpec((K, TWK, TWout), lambda s: (0, 0, 0)),
        ],
        out_specs=pl.BlockSpec((Bg, M, TWout), lambda s: (s, 0, 0)),
        compiler_params=pltpu.CompilerParams(
            dimension_semantics=("parallel",),
            vmem_limit_bytes=vmem_limit),
    )(x_stk, toep)

    if Sb > 1:                                    # drop inter-slab junk rows
        ridx = (jnp.arange(Sb)[:, None] * THK + jnp.arange(TH)[None, :]).reshape(-1)
        out = out[:, ridx, :]
    out = out.reshape(NS, TH, TWout)[:, :, :TW]   # drop lane padding
    out = out.reshape(NC, nt_r, nt_c, TH, TW).transpose(0, 1, 3, 2, 4).reshape(NC, Hg, Wg)
    return out[:, :H, :W].reshape(N, C, H, W)


def random_mixed_gaussian_blur(image, key):
    """Forward pass of RandomMixedGaussianBlur."""
    kernel = random_mixed_kernel(key)
    return filter2d(image, kernel)


# ----------------------------------------------------------------------------
# Reference (XLA depthwise cross-correlation) and driver.
# ----------------------------------------------------------------------------
def _reference_filter2d(x, kernel):
    N, C, H, W = x.shape
    K = kernel.shape[0]
    pad = K // 2
    padded = jnp.pad(x, ((0, 0), (0, 0), (pad, pad), (pad, pad)), mode="reflect")
    rhs = jnp.broadcast_to(kernel[None, None], (C, 1, K, K)).astype(jnp.float32)
    ref = jax.lax.conv_general_dilated(
        padded.astype(jnp.float32), rhs, window_strides=(1, 1), padding="VALID",
        dimension_numbers=("NCHW", "OIHW", "NCHW"), feature_group_count=C,
        precision=jax.lax.Precision.HIGHEST)
    return ref.astype(x.dtype)


if __name__ == "__main__":
    key = jax.random.PRNGKey(0)
    k_img, k_blur, k_img2 = jax.random.split(key, 3)

    # Small module-shaped case (NCHW) -> exercises the channel-stacking (fold) path.
    N, C, H, W = 2, 4, 16, 16
    x = jax.random.normal(k_img, (N, C, H, W), dtype=jnp.float32)

    blur_kernel = random_mixed_kernel(k_blur)
    y = jax.block_until_ready(filter2d(x, blur_kernel))
    ref = _reference_filter2d(x, blur_kernel)
    assert y.shape == (N, C, H, W)
    # bf16 MXU operands (deliberate) -> relaxed tolerance vs the exact-f32 reference.
    assert jnp.allclose(y, ref, atol=2e-2, rtol=2e-2), float(jnp.max(jnp.abs(y - ref)))

    # Larger case exercising the row/column halo-tiled path (nt_r=2, nt_c=2).
    x2 = jax.random.normal(k_img2, (1, 2, 200, 140), dtype=jnp.float32)
    y2 = jax.block_until_ready(filter2d(x2, blur_kernel))
    ref2 = _reference_filter2d(x2, blur_kernel)
    assert y2.shape == x2.shape
    assert jnp.allclose(y2, ref2, atol=2e-2, rtol=2e-2), float(jnp.max(jnp.abs(y2 - ref2)))

    # Full forward pass of the module once.
    out = jax.block_until_ready(random_mixed_gaussian_blur(x, k_blur))
    assert out.shape == (N, C, H, W)

    print("KERNEL_OK")
</pallas_src>

<mosaic_0001>
module attributes {stable_mosaic.version = 11 : i64} {
  func.func @_filter2d_kernel(%arg0: i32, %arg1: memref<1x144x36xbf16, #tpu.memory_space<vmem>>, %arg2: memref<21x36x128xbf16, #tpu.memory_space<vmem>>, %arg3: memref<1x124x128xf32, #tpu.memory_space<vmem>>) attributes {dimension_semantics = [#tpu.dimension_semantics<parallel>], iteration_bounds = array<i64: 2>, scalar_prefetch = 0 : i64, scratch_operands = 0 : i64, tpu.core_type = #tpu.core_type<tc>, window_params = [{transform_indices = @transform_0, window_bounds = array<i64: 1, 144, 36>}, {pipeline_mode = #tpu.pipeline_mode<synchronous>, transform_indices = @transform_1, window_bounds = array<i64: 21, 36, 128>}, {transform_indices = @transform_2, window_bounds = array<i64: 1, 124, 128>}]} {
    %c0 = arith.constant 0 : index
    %c0_0 = arith.constant 0 : index
    %c0_1 = arith.constant 0 : index
    %0 = vector.load %arg1[%c0, %c0_0, %c0_1] : memref<1x144x36xbf16, #tpu.memory_space<vmem>>, vector<1x144x36xbf16>
    %1 = vector.shape_cast %0 : vector<1x144x36xbf16> to vector<144x36xbf16>
    %cst = arith.constant 0.000000e+00 : f32
    %2 = vector.broadcast %cst : f32 to vector<124x128xf32>
    %3 = vector.extract_strided_slice %1 {offsets = [0, 0], sizes = [124, 36], strides = [1, 1]} : vector<144x36xbf16> to vector<124x36xbf16>
    %c0_2 = arith.constant 0 : index
    %c0_3 = arith.constant 0 : index
    %c0_4 = arith.constant 0 : index
    %4 = vector.load %arg2[%c0_2, %c0_3, %c0_4] : memref<21x36x128xbf16, #tpu.memory_space<vmem>>, vector<1x36x128xbf16>
    %5 = vector.shape_cast %4 : vector<1x36x128xbf16> to vector<36x128xbf16>
    %cst_5 = arith.constant dense<0.000000e+00> : vector<124x128xf32>
    %6 = tpu.matmul %3, %5, %cst_5 {dimension_numbers = #tpu.dot_dimension_numbers<[1], [0], [0], [1], [0, 0, 1, 1], [], []>} : vector<124x36xbf16>, vector<36x128xbf16>, vector<124x128xf32> -> vector<124x128xf32>
    %7 = arith.addf %2, %6 : vector<124x128xf32>
    %8 = vector.extract_strided_slice %1 {offsets = [1, 0], sizes = [124, 36], strides = [1, 1]} : vector<144x36xbf16> to vector<124x36xbf16>
    %c1 = arith.constant 1 : index
    %c0_6 = arith.constant 0 : index
    %c0_7 = arith.constant 0 : index
    %9 = vector.load %arg2[%c1, %c0_6, %c0_7] : memref<21x36x128xbf16, #tpu.memory_space<vmem>>, vector<1x36x128xbf16>
    %10 = vector.shape_cast %9 : vector<1x36x128xbf16> to vector<36x128xbf16>
    %cst_8 = arith.constant dense<0.000000e+00> : vector<124x128xf32>
    %11 = tpu.matmul %8, %10, %cst_8 {dimension_numbers = #tpu.dot_dimension_numbers<[1], [0], [0], [1], [0, 0, 1, 1], [], []>} : vector<124x36xbf16>, vector<36x128xbf16>, vector<124x128xf32> -> vector<124x128xf32>
    %12 = arith.addf %7, %11 : vector<124x128xf32>
    %13 = vector.extract_strided_slice %1 {offsets = [2, 0], sizes = [124, 36], strides = [1, 1]} : vector<144x36xbf16> to vector<124x36xbf16>
    %c2 = arith.constant 2 : index
    %c0_9 = arith.constant 0 : index
    %c0_10 = arith.constant 0 : index
    %14 = vector.load %arg2[%c2, %c0_9, %c0_10] : memref<21x36x128xbf16, #tpu.memory_space<vmem>>, vector<1x36x128xbf16>
    %15 = vector.shape_cast %14 : vector<1x36x128xbf16> to vector<36x128xbf16>
    %cst_11 = arith.constant dense<0.000000e+00> : vector<124x128xf32>
    %16 = tpu.matmul %13, %15, %cst_11 {dimension_numbers = #tpu.dot_dimension_numbers<[1], [0], [0], [1], [0, 0, 1, 1], [], []>} : vector<124x36xbf16>, vector<36x128xbf16>, vector<124x128xf32> -> vector<124x128xf32>
    %17 = arith.addf %12, %16 : vector<124x128xf32>
    %18 = vector.extract_strided_slice %1 {offsets = [3, 0], sizes = [124, 36], strides = [1, 1]} : vector<144x36xbf16> to vector<124x36xbf16>
    %c3 = arith.constant 3 : index
    %c0_12 = arith.constant 0 : index
    %c0_13 = arith.constant 0 : index
    %19 = vector.load %arg2[%c3, %c0_12, %c0_13] : memref<21x36x128xbf16, #tpu.memory_space<vmem>>, vector<1x36x128xbf16>
    %20 = vector.shape_cast %19 : vector<1x36x128xbf16> to vector<36x128xbf16>
    %cst_14 = arith.constant dense<0.000000e+00> : vector<124x128xf32>
    %21 = tpu.matmul %18, %20, %cst_14 {dimension_numbers = #tpu.dot_dimension_numbers<[1], [0], [0], [1], [0, 0, 1, 1], [], []>} : vector<124x36xbf16>, vector<36x128xbf16>, vector<124x128xf32> -> vector<124x128xf32>
    %22 = arith.addf %17, %21 : vector<124x128xf32>
    %23 = vector.extract_strided_slice %1 {offsets = [4, 0], sizes = [124, 36], strides = [1, 1]} : vector<144x36xbf16> to vector<124x36xbf16>
    %c4 = arith.constant 4 : index
    %c0_15 = arith.constant 0 : index
    %c0_16 = arith.constant 0 : index
    %24 = vector.load %arg2[%c4, %c0_15, %c0_16] : memref<21x36x128xbf16, #tpu.memory_space<vmem>>, vector<1x36x128xbf16>
    %25 = vector.shape_cast %24 : vector<1x36x128xbf16> to vector<36x128xbf16>
    %cst_17 = arith.constant dense<0.000000e+00> : vector<124x128xf32>
    %26 = tpu.matmul %23, %25, %cst_17 {dimension_numbers = #tpu.dot_dimension_numbers<[1], [0], [0], [1], [0, 0, 1, 1], [], []>} : vector<124x36xbf16>, vector<36x128xbf16>, vector<124x128xf32> -> vector<124x128xf32>
    %27 = arith.addf %22, %26 : vector<124x128xf32>
    %28 = vector.extract_strided_slice %1 {offsets = [5, 0], sizes = [124, 36], strides = [1, 1]} : vector<144x36xbf16> to vector<124x36xbf16>
    %c5 = arith.constant 5 : index
    %c0_18 = arith.constant 0 : index
    %c0_19 = arith.constant 0 : index
    %29 = vector.load %arg2[%c5, %c0_18, %c0_19] : memref<21x36x128xbf16, #tpu.memory_space<vmem>>, vector<1x36x128xbf16>
    %30 = vector.shape_cast %29 : vector<1x36x128xbf16> to vector<36x128xbf16>
    %cst_20 = arith.constant dense<0.000000e+00> : vector<124x128xf32>
    %31 = tpu.matmul %28, %30, %cst_20 {dimension_numbers = #tpu.dot_dimension_numbers<[1], [0], [0], [1], [0, 0, 1, 1], [], []>} : vector<124x36xbf16>, vector<36x128xbf16>, vector<124x128xf32> -> vector<124x128xf32>
    %32 = arith.addf %27, %31 : vector<124x128xf32>
    %33 = vector.extract_strided_slice %1 {offsets = [6, 0], sizes = [124, 36], strides = [1, 1]} : vector<144x36xbf16> to vector<124x36xbf16>
    %c6 = arith.constant 6 : index
    %c0_21 = arith.constant 0 : index
    %c0_22 = arith.constant 0 : index
    %34 = vector.load %arg2[%c6, %c0_21, %c0_22] : memref<21x36x128xbf16, #tpu.memory_space<vmem>>, vector<1x36x128xbf16>
    %35 = vector.shape_cast %34 : vector<1x36x128xbf16> to vector<36x128xbf16>
    %cst_23 = arith.constant dense<0.000000e+00> : vector<124x128xf32>
    %36 = tpu.matmul %33, %35, %cst_23 {dimension_numbers = #tpu.dot_dimension_numbers<[1], [0], [0], [1], [0, 0, 1, 1], [], []>} : vector<124x36xbf16>, vector<36x128xbf16>, vector<124x128xf32> -> vector<124x128xf32>
    %37 = arith.addf %32, %36 : vector<124x128xf32>
    %38 = vector.extract_strided_slice %1 {offsets = [7, 0], sizes = [124, 36], strides = [1, 1]} : vector<144x36xbf16> to vector<124x36xbf16>
    %c7 = arith.constant 7 : index
    %c0_24 = arith.constant 0 : index
    %c0_25 = arith.constant 0 : index
    %39 = vector.load %arg2[%c7, %c0_24, %c0_25] : memref<21x36x128xbf16, #tpu.memory_space<vmem>>, vector<1x36x128xbf16>
    %40 = vector.shape_cast %39 : vector<1x36x128xbf16> to vector<36x128xbf16>
    %cst_26 = arith.constant dense<0.000000e+00> : vector<124x128xf32>
    %41 = tpu.matmul %38, %40, %cst_26 {dimension_numbers = #tpu.dot_dimension_numbers<[1], [0], [0], [1], [0, 0, 1, 1], [], []>} : vector<124x36xbf16>, vector<36x128xbf16>, vector<124x128xf32> -> vector<124x128xf32>
    %42 = arith.addf %37, %41 : vector<124x128xf32>
    %43 = vector.extract_strided_slice %1 {offsets = [8, 0], sizes = [124, 36], strides = [1, 1]} : vector<144x36xbf16> to vector<124x36xbf16>
    %c8 = arith.constant 8 : index
    %c0_27 = arith.constant 0 : index
    %c0_28 = arith.constant 0 : index
    %44 = vector.load %arg2[%c8, %c0_27, %c0_28] : memref<21x36x128xbf16, #tpu.memory_space<vmem>>, vector<1x36x128xbf16>
    %45 = vector.shape_cast %44 : vector<1x36x128xbf16> to vector<36x128xbf16>
    %cst_29 = arith.constant dense<0.000000e+00> : vector<124x128xf32>
    %46 = tpu.matmul %43, %45, %cst_29 {dimension_numbers = #tpu.dot_dimension_numbers<[1], [0], [0], [1], [0, 0, 1, 1], [], []>} : vector<124x36xbf16>, vector<36x128xbf16>, vector<124x128xf32> -> vector<124x128xf32>
    %47 = arith.addf %42, %46 : vector<124x128xf32>
    %48 = vector.extract_strided_slice %1 {offsets = [9, 0], sizes = [124, 36], strides = [1, 1]} : vector<144x36xbf16> to vector<124x36xbf16>
    %c9 = arith.constant 9 : index
    %c0_30 = arith.constant 0 : index
    %c0_31 = arith.constant 0 : index
    %49 = vector.load %arg2[%c9, %c0_30, %c0_31] : memref<21x36x128xbf16, #tpu.memory_space<vmem>>, vector<1x36x128xbf16>
    %50 = vector.shape_cast %49 : vector<1x36x128xbf16> to vector<36x128xbf16>
    %cst_32 = arith.constant dense<0.000000e+00> : vector<124x128xf32>
    %51 = tpu.matmul %48, %50, %cst_32 {dimension_numbers = #tpu.dot_dimension_numbers<[1], [0], [0], [1], [0, 0, 1, 1], [], []>} : vector<124x36xbf16>, vector<36x128xbf16>, vector<124x128xf32> -> vector<124x128xf32>
    %52 = arith.addf %47, %51 : vector<124x128xf32>
    %53 = vector.extract_strided_slice %1 {offsets = [10, 0], sizes = [124, 36], strides = [1, 1]} : vector<144x36xbf16> to vector<124x36xbf16>
    %c10 = arith.constant 10 : index
    %c0_33 = arith.constant 0 : index
    %c0_34 = arith.constant 0 : index
    %54 = vector.load %arg2[%c10, %c0_33, %c0_34] : memref<21x36x128xbf16, #tpu.memory_space<vmem>>, vector<1x36x128xbf16>
    %55 = vector.shape_cast %54 : vector<1x36x128xbf16> to vector<36x128xbf16>
    %cst_35 = arith.constant dense<0.000000e+00> : vector<124x128xf32>
    %56 = tpu.matmul %53, %55, %cst_35 {dimension_numbers = #tpu.dot_dimension_numbers<[1], [0], [0], [1], [0, 0, 1, 1], [], []>} : vector<124x36xbf16>, vector<36x128xbf16>, vector<124x128xf32> -> vector<124x128xf32>
    %57 = arith.addf %52, %56 : vector<124x128xf32>
    %58 = vector.extract_strided_slice %1 {offsets = [11, 0], sizes = [124, 36], strides = [1, 1]} : vector<144x36xbf16> to vector<124x36xbf16>
    %c11 = arith.constant 11 : index
    %c0_36 = arith.constant 0 : index
    %c0_37 = arith.constant 0 : index
    %59 = vector.load %arg2[%c11, %c0_36, %c0_37] : memref<21x36x128xbf16, #tpu.memory_space<vmem>>, vector<1x36x128xbf16>
    %60 = vector.shape_cast %59 : vector<1x36x128xbf16> to vector<36x128xbf16>
    %cst_38 = arith.constant dense<0.000000e+00> : vector<124x128xf32>
    %61 = tpu.matmul %58, %60, %cst_38 {dimension_numbers = #tpu.dot_dimension_numbers<[1], [0], [0], [1], [0, 0, 1, 1], [], []>} : vector<124x36xbf16>, vector<36x128xbf16>, vector<124x128xf32> -> vector<124x128xf32>
    %62 = arith.addf %57, %61 : vector<124x128xf32>
    %63 = vector.extract_strided_slice %1 {offsets = [12, 0], sizes = [124, 36], strides = [1, 1]} : vector<144x36xbf16> to vector<124x36xbf16>
    %c12 = arith.constant 12 : index
    %c0_39 = arith.constant 0 : index
    %c0_40 = arith.constant 0 : index
    %64 = vector.load %arg2[%c12, %c0_39, %c0_40] : memref<21x36x128xbf16, #tpu.memory_space<vmem>>, vector<1x36x128xbf16>
    %65 = vector.shape_cast %64 : vector<1x36x128xbf16> to vector<36x128xbf16>
    %cst_41 = arith.constant dense<0.000000e+00> : vector<124x128xf32>
    %66 = tpu.matmul %63, %65, %cst_41 {dimension_numbers = #tpu.dot_dimension_numbers<[1], [0], [0], [1], [0, 0, 1, 1], [], []>} : vector<124x36xbf16>, vector<36x128xbf16>, vector<124x128xf32> -> vector<124x128xf32>
    %67 = arith.addf %62, %66 : vector<124x128xf32>
    %68 = vector.extract_strided_slice %1 {offsets = [13, 0], sizes = [124, 36], strides = [1, 1]} : vector<144x36xbf16> to vector<124x36xbf16>
    %c13 = arith.constant 13 : index
    %c0_42 = arith.constant 0 : index
    %c0_43 = arith.constant 0 : index
    %69 = vector.load %arg2[%c13, %c0_42, %c0_43] : memref<21x36x128xbf16, #tpu.memory_space<vmem>>, vector<1x36x128xbf16>
    %70 = vector.shape_cast %69 : vector<1x36x128xbf16> to vector<36x128xbf16>
    %cst_44 = arith.constant dense<0.000000e+00> : vector<124x128xf32>
    %71 = tpu.matmul %68, %70, %cst_44 {dimension_numbers = #tpu.dot_dimension_numbers<[1], [0], [0], [1], [0, 0, 1, 1], [], []>} : vector<124x36xbf16>, vector<36x128xbf16>, vector<124x128xf32> -> vector<124x128xf32>
    %72 = arith.addf %67, %71 : vector<124x128xf32>
    %73 = vector.extract_strided_slice %1 {offsets = [14, 0], sizes = [124, 36], strides = [1, 1]} : vector<144x36xbf16> to vector<124x36xbf16>
    %c14 = arith.constant 14 : index
    %c0_45 = arith.constant 0 : index
    %c0_46 = arith.constant 0 : index
    %74 = vector.load %arg2[%c14, %c0_45, %c0_46] : memref<21x36x128xbf16, #tpu.memory_space<vmem>>, vector<1x36x128xbf16>
    %75 = vector.shape_cast %74 : vector<1x36x128xbf16> to vector<36x128xbf16>
    %cst_47 = arith.constant dense<0.000000e+00> : vector<124x128xf32>
    %76 = tpu.matmul %73, %75, %cst_47 {dimension_numbers = #tpu.dot_dimension_numbers<[1], [0], [0], [1], [0, 0, 1, 1], [], []>} : vector<124x36xbf16>, vector<36x128xbf16>, vector<124x128xf32> -> vector<124x128xf32>
    %77 = arith.addf %72, %76 : vector<124x128xf32>
    %78 = vector.extract_strided_slice %1 {offsets = [15, 0], sizes = [124, 36], strides = [1, 1]} : vector<144x36xbf16> to vector<124x36xbf16>
    %c15 = arith.constant 15 : index
    %c0_48 = arith.constant 0 : index
    %c0_49 = arith.constant 0 : index
    %79 = vector.load %arg2[%c15, %c0_48, %c0_49] : memref<21x36x128xbf16, #tpu.memory_space<vmem>>, vector<1x36x128xbf16>
    %80 = vector.shape_cast %79 : vector<1x36x128xbf16> to vector<36x128xbf16>
    %cst_50 = arith.constant dense<0.000000e+00> : vector<124x128xf32>
    %81 = tpu.matmul %78, %80, %cst_50 {dimension_numbers = #tpu.dot_dimension_numbers<[1], [0], [0], [1], [0, 0, 1, 1], [], []>} : vector<124x36xbf16>, vector<36x128xbf16>, vector<124x128xf32> -> vector<124x128xf32>
    %82 = arith.addf %77, %81 : vector<124x128xf32>
    %83 = vector.extract_strided_slice %1 {offsets = [16, 0], sizes = [124, 36], strides = [1, 1]} : vector<144x36xbf16> to vector<124x36xbf16>
    %c16 = arith.constant 16 : index
    %c0_51 = arith.constant 0 : index
    %c0_52 = arith.constant 0 : index
    %84 = vector.load %arg2[%c16, %c0_51, %c0_52] : memref<21x36x128xbf16, #tpu.memory_space<vmem>>, vector<1x36x128xbf16>
    %85 = vector.shape_cast %84 : vector<1x36x128xbf16> to vector<36x128xbf16>
    %cst_53 = arith.constant dense<0.000000e+00> : vector<124x128xf32>
    %86 = tpu.matmul %83, %85, %cst_53 {dimension_numbers = #tpu.dot_dimension_numbers<[1], [0], [0], [1], [0, 0, 1, 1], [], []>} : vector<124x36xbf16>, vector<36x128xbf16>, vector<124x128xf32> -> vector<124x128xf32>
    %87 = arith.addf %82, %86 : vector<124x128xf32>
    %88 = vector.extract_strided_slice %1 {offsets = [17, 0], sizes = [124, 36], strides = [1, 1]} : vector<144x36xbf16> to vector<124x36xbf16>
    %c17 = arith.constant 17 : index
    %c0_54 = arith.constant 0 : index
    %c0_55 = arith.constant 0 : index
    %89 = vector.load %arg2[%c17, %c0_54, %c0_55] : memref<21x36x128xbf16, #tpu.memory_space<vmem>>, vector<1x36x128xbf16>
    %90 = vector.shape_cast %89 : vector<1x36x128xbf16> to vector<36x128xbf16>
    %cst_56 = arith.constant dense<0.000000e+00> : vector<124x128xf32>
    %91 = tpu.matmul %88, %90, %cst_56 {dimension_numbers = #tpu.dot_dimension_numbers<[1], [0], [0], [1], [0, 0, 1, 1], [], []>} : vector<124x36xbf16>, vector<36x128xbf16>, vector<124x128xf32> -> vector<124x128xf32>
    %92 = arith.addf %87, %91 : vector<124x128xf32>
    %93 = vector.extract_strided_slice %1 {offsets = [18, 0], sizes = [124, 36], strides = [1, 1]} : vector<144x36xbf16> to vector<124x36xbf16>
    %c18 = arith.constant 18 : index
    %c0_57 = arith.constant 0 : index
    %c0_58 = arith.constant 0 : index
    %94 = vector.load %arg2[%c18, %c0_57, %c0_58] : memref<21x36x128xbf16, #tpu.memory_space<vmem>>, vector<1x36x128xbf16>
    %95 = vector.shape_cast %94 : vector<1x36x128xbf16> to vector<36x128xbf16>
    %cst_59 = arith.constant dense<0.000000e+00> : vector<124x128xf32>
    %96 = tpu.matmul %93, %95, %cst_59 {dimension_numbers = #tpu.dot_dimension_numbers<[1], [0], [0], [1], [0, 0, 1, 1], [], []>} : vector<124x36xbf16>, vector<36x128xbf16>, vector<124x128xf32> -> vector<124x128xf32>
    %97 = arith.addf %92, %96 : vector<124x128xf32>
    %98 = vector.extract_strided_slice %1 {offsets = [19, 0], sizes = [124, 36], strides = [1, 1]} : vector<144x36xbf16> to vector<124x36xbf16>
    %c19 = arith.constant 19 : index
    %c0_60 = arith.constant 0 : index
    %c0_61 = arith.constant 0 : index
    %99 = vector.load %arg2[%c19, %c0_60, %c0_61] : memref<21x36x128xbf16, #tpu.memory_space<vmem>>, vector<1x36x128xbf16>
    %100 = vector.shape_cast %99 : vector<1x36x128xbf16> to vector<36x128xbf16>
    %cst_62 = arith.constant dense<0.000000e+00> : vector<124x128xf32>
    %101 = tpu.matmul %98, %100, %cst_62 {dimension_numbers = #tpu.dot_dimension_numbers<[1], [0], [0], [1], [0, 0, 1, 1], [], []>} : vector<124x36xbf16>, vector<36x128xbf16>, vector<124x128xf32> -> vector<124x128xf32>
    %102 = arith.addf %97, %101 : vector<124x128xf32>
    %103 = vector.extract_strided_slice %1 {offsets = [20, 0], sizes = [124, 36], strides = [1, 1]} : vector<144x36xbf16> to vector<124x36xbf16>
    %c20 = arith.constant 20 : index
    %c0_63 = arith.constant 0 : index
    %c0_64 = arith.constant 0 : index
    %104 = vector.load %arg2[%c20, %c0_63, %c0_64] : memref<21x36x128xbf16, #tpu.memory_space<vmem>>, vector<1x36x128xbf16>
    %105 = vector.shape_cast %104 : vector<1x36x128xbf16> to vector<36x128xbf16>
    %cst_65 = arith.constant dense<0.000000e+00> : vector<124x128xf32>
    %106 = tpu.matmul %103, %105, %cst_65 {dimension_numbers = #tpu.dot_dimension_numbers<[1], [0], [0], [1], [0, 0, 1, 1], [], []>} : vector<124x36xbf16>, vector<36x128xbf16>, vector<124x128xf32> -> vector<124x128xf32>
    %107 = arith.addf %102, %106 : vector<124x128xf32>
    %c0_66 = arith.constant 0 : index
    %c0_67 = arith.constant 0 : index
    %c0_68 = arith.constant 0 : index
    %108 = vector.load %arg3[%c0_66, %c0_67, %c0_68] : memref<1x124x128xf32, #tpu.memory_space<vmem>>, vector<1x124x128xf32>
    %109 = vector.shape_cast %108 : vector<1x124x128xf32> to vector<124x128xf32>
    %110 = vector.shape_cast %107 : vector<124x128xf32> to vector<1x124x128xf32>
    tpu.vector_store %arg3[%c0_66, %c0_67, %c0_68], %110 {strides = array<i32>} : memref<1x124x128xf32, #tpu.memory_space<vmem>>, vector<1x124x128xf32>,
    return
  }
  func.func @transform_0(%arg0: i32) -> (i32, i32, i32) {
    %c0_i32 = arith.constant 0 : i32
    %c0_i32_0 = arith.constant 0 : i32
    %c0_i32_1 = arith.constant 0 : i32
    return %arg0, %c0_i32, %c0_i32_0 : i32, i32, i32
  }
  func.func @transform_1(%arg0: i32) -> (i32, i32, i32) {
    %c0_i32 = arith.constant 0 : i32
    %c0_i32_0 = arith.constant 0 : i32
    %c0_i32_1 = arith.constant 0 : i32
    %c0_i32_2 = arith.constant 0 : i32
    return %c0_i32, %c0_i32_0, %c0_i32_1 : i32, i32, i32
  }
  func.func @transform_2(%arg0: i32) -> (i32, i32, i32) {
    %c0_i32 = arith.constant 0 : i32
    %c0_i32_0 = arith.constant 0 : i32
    %c0_i32_1 = arith.constant 0 : i32
    return %arg0, %c0_i32, %c0_i32_0 : i32, i32, i32
  }
}

</mosaic_0001>

<bundles_post_ra>
// kernel: tpu_custom_call.1
= control target key start
LH: loop header
LB: loop body
LE: loop exit
PB: predicated region body
PF: predicated region fallthrough
CT: control target
= control target key end

     0   :  { %7 = vsyncpa [#allocation3], 0  ;;  %s5476_s9 = smov 0   ;;  %s6451_s0 = inlined_call_operand.vmem [shape: bf16[2,144,36], index: 0, kind: input, shape index: {}]   ;;  %s6452_s1 = inlined_call_operand.hbm [shape: bf16[21,36,128], index: 1, kind: input, shape index: {}]   ;;  %s6453_s2 = inlined_call_operand.vmem [shape: f32[2,124,128], index: 2, kind: output, shape index: {}]  }
   0x1 LB: > { %s5482_s10 = sadd.s32 4294967295, %s5456_s9   ;;  %p4009_p0 = scmp.ge.s32.totalorder %s5456_s9, 1  ;;  %s5456_s9 = sphi %s5476_s9, %s13_s9  }
   0x2   : > { %p91_p1 = scmp.lt.s32.totalorder %s5456_s9, 3  ;;  %s5458_s11 = smov [#allocation2]  }
   0x3   : > { %s103_s12 = sshll.u32 %s5458_s11, 4  ;;  %p6454_p3 = scmp.eq.s32.totalorder %s5482_s10, 0  ;;  %s104_s12 = int_to_ptr.vmem [resolvable:$true] %s103_s12 }
   0x4   : > { %p5486_p2 = pnand %p4009_p0, %p91_p1  ;;  %s5418_s17 = scalar_lea.hbm %s6452_s1, 6720 }
   0x5   : > { %p5419_p6 = scmp.ne.s32.totalorder %s6452_s1, %s5418_s17  ;;  %p5425_p10 = scmp.lt.u32.totalorder %s5418_s17, %s6452_s1 }
   0x6   : > { %s6514_s13 = scalar_select %p5486_p2, 1, 0 }
   0x7   : > { %p5316_p4 = pneg %p5486_p2 }
   0x9   : > { %p5495_p5 = pnand %p6454_p3, %p5316_p4 }
   0xb   : > { %p5420_p7 = pneg %p5495_p5 }
   0xd   : > { %p5421_p8 = pnand %p5420_p7, %p5419_p6 }
   0xf   : > { %p5422_p9 = pneg %p5421_p8 }
  0x11   : > { %p5427_p11 = pnand %p5425_p10, %p5422_p9 }
  0x13   : > { %5430 = shalt.err (!%p5427_p11)
}
  0x14   : > { %s5431_s22 = scalar_lea.vmem %s104_s12, 6720  ;;  %p5439_p1 = scmp.lt.s32.totalorder %s104_s12, %s104_s12 }
  0x15   : > { %p5432_p12 = scmp.ne.s32.totalorder %s104_s12, %s5431_s22  ;;  %p5440_p4 = scmp.lt.s32.totalorder %s5431_s22, %s5431_s22 }
  0x17   : > { %p5434_p13 = pnand %p5432_p12, %p5420_p7  ;;  %p5441_p3 = por %p5440_p4, %p5439_p1 }
  0x19   : > { %p5435_p0 = pneg %p5434_p13 }
  0x1b   : > { %p5442_p2 = pnand %p5441_p3, %p5435_p0 }
  0x1d   : > { %5445 = shalt.err (!%p5442_p2)
}
  0x1e   : > { %s5459_s23 = smov 64   ;;  %s5460_s24 = smov 4  }
  0x1f   : > { %5319 = dma.hbm_to_vmem [thread:$0]  (!%p5495_p5), %s6452_s1, 6720, %s104_s12, [#allocation3], %s5459_s23, %s5459_s23, %s5460_s24  }
  0x20   : > { %p6516_p6 = scmp.ne.s32.totalorder %s6514_s13, 0 }
  0x22   : > { %127 = sbr.rel (%p6516_p6) target bundleno = 607 (0x25f), region = 28 }
  0x29   : > { %p6517_p8 = scmp.eq.s32.totalorder %s5482_s10, 0 }
  0x2b   : > { %5451 = dma.done.wait (%p6517_p8), [#allocation3], 6720   ;;  %p6518_p7 = pmov %p6517_p8 }
  0x2c   : > { %p149_p2 = scmp.lt.s32.totalorder %s5482_s10, 1  ;;  %v5333_v0 = vld [vmem:[#allocation2 + $0x14] sm:$0xff]   ;;  %v5334_v1 = vld [vmem:[#allocation2 + $0xc8] sm:$0xff]   ;;  %v5335_v2 = vld [vmem:[#allocation2 + $0x1c] sm:$0xff]   ;;  %vm333_vm0 = vcmask 1041408   ;;  %vm308_vm2 = vcmask 293888  }
  0x2d   : > { %5453 = vsyncadd (%p6518_p7), [#allocation3], 4294960576  ;;  %4501 = vmatprep.subr.bf16.mxu1 %v5333_v0  ;;  %4721 = vmatprep.subr.bf16.mxu0 %v5334_v1  ;;  %v5336_v3 = vld [vmem:[#allocation2 + $0xd0] sm:$0xff]   ;;  %v5337_v4 = vld [vmem:[#allocation2 + $0x24] ss:$0 sps:$4 sm:$0x33]  }
  0x2e   : > { %s6621_s10 = smov (!%p149_p2, %s5482_s10), 1  ;;  %4502 = vmatpush3.bf16.msra.mxu1 %v5333_v0  ;;  %4722 = vmatpush3.bf16.msra.mxu0 %v5334_v1  ;;  %vm229_vm1 = vsmask.f32 7424  ;;  %v5338_v5 = vld [vmem:[#allocation2 + $0xd8] ss:$0 sps:$4 sm:$0x33]  }
  0x2f   : > { %s5311_s27 = smul.u32 72, %s6621_s10  ;;  %4503 = vmatprep.subr.bf16.mxu1 %v5335_v2  ;;  %4723 = vmatprep.subr.bf16.mxu0 %v5336_v3  ;;  %vm571_vm3 = vcmask 1046528   ;;  %v5533_v8 = vld [vmem:[#allocation2] sm:$0xff]   ;;  %v335_v9 = vsel %vm333_vm0, %v5337_v4, 0  ;;  %v5537_v10 = vsel %vm333_vm0, %v5338_v5, 0  ;;  %v5357_v53 = vld [vmem:[#allocation2 + $0x8] sm:$0xff]  }
  0x30   : > { %6519 = vst [vmem:[#allocation5_spill] sm:$0xff] %v5537_v10  ;;  %v5347_v14 = vld [vmem:[#allocation2 + $0xdc] sm:$0xff]   ;;  %v5348_v33 = vld [vmem:[#allocation2 + $0xe4] sm:$0xff]   ;;  %vm748_vm4 = vsmask.f32 6400  ;;  %vm941_vm5 = vcmask 1045504  }
  0x31   : > { %s5529_s30 = scalar_lea.vmem %s6451_s0, %s5311_s27  ;;  %vm1121_vm6 = vsmask.f32 5376  ;;  %vm1319_vm7 = vcmask 1044480   ;;  %vm1498_vm8 = vsmask.f32 4352  ;;  %s4269_s3 = sshll.u32 %s6621_s10, 7 }
  0x32   : > { %v160_v6 = vld [vmem:[%s5529_s30] sm:$0xf]  ;;  %v161_v7 = vld [vmem:[%s5529_s30 + $0x4] sm:$0xf]  ;;  %4504 = vmatpush3.bf16.msra.mxu1 %v5335_v2  ;;  %v162_v11 = vld [vmem:[%s5529_s30 + $0x8] sm:$0xf]  ;;  %4724 = vmatpush3.bf16.msra.mxu0 %v5336_v3  ;;  %s6430_s6 = scalar_lea.vmem %s6453_s2, %s4269_s3 }
  0x33   : > { %v163_v12 = vld [vmem:[%s5529_s30 + $0xc] sm:$0xf]  ;;  %v5541_v13 = vcombine.low %v160_v6, %v161_v7  ;;  %5289 = vmatprep.subr.msk.bf16.mxu1 %vm333_vm0, %v5337_v4  ;;  %v164_v16 = vld [vmem:[%s5529_s30 + $0x10] sm:$0xf]  ;;  %v165_v17 = vld [vmem:[%s5529_s30 + $0x14] sm:$0xf]  ;;  %v5548_v18 = vcombine.low %v161_v7, %v162_v11  ;;  %5299 = vmatprep.subr.msk.bf16.mxu0 %vm333_vm0, %v5338_v5 }
  0x34   : > { %v5544_v15 = vcombine.low %v162_v11, %v163_v12  ;;  %v5557_v21 = vcombine.low %v164_v16, %v165_v17  ;;  %v5559_v22 = vcombine.low %v163_v12, %v164_v16  ;;  %v166_v23 = vld [vmem:[%s5529_s30 + $0x18] sm:$0xf]  ;;  %v167_v27 = vld [vmem:[%s5529_s30 + $0x1c] sm:$0xf]  ;;  %v168_v40 = vld [vmem:[%s5529_s30 + $0x20] sm:$0xf] }
  0x35   : > { %v5552_v19 = vshrl.u32 %v5541_v13, 16  ;;  %v5555_v20 = vshll.u32 %v5541_v13, 16  ;;  %v2082_v26 = vrot.slane %v5548_v18, 1  ;;  %v5570_v28 = vcombine.low %v165_v17, %v166_v23  ;;  %v169_v44 = vld [vmem:[%s5529_s30 + $0x24] sm:$0xf] }
  0x36   : > { %6520 = vst [vmem:[#allocation6_spill] sm:$0xff] %v5559_v22  ;;  %v5563_v24 = vshll.u32 %v5544_v15, 16  ;;  %v5566_v25 = vshrl.u32 %v5544_v15, 16  ;;  %4506 = vmatpush3.bf16.msra.mxu1 %v335_v9  ;;  %v2083_v30 = vrot.slane %v5559_v22, 1  ;;  %v5575_v31 = vshll.u32 %v5557_v21, 16  ;;  %4726 = vmatpush3.bf16.msra.mxu0 %v5537_v10  ;;  %v5657_v9 = vld [vmem:[#allocation2 + $0xf0] sm:$0xff]  }
  0x37   : > { %v235_v29 = vrot.slane %v5555_v20, 1  ;;  %v5577_v32 = vcombine.low %v166_v23, %v167_v27  ;;  %4523 = vmatprep.subr.bf16.mxu1 %v5533_v8  ;;  %v2085_v35 = vrot.slane %v5570_v28, 1  ;;  %4743 = vmatprep.subr.bf16.mxu0 %v5347_v14  ;;  %v5587_v39 = vshrl.u32 %v5557_v21, 16  ;;  %v170_v46 = vld [vmem:[%s5529_s30 + $0x28] sm:$0xf] }
  0x38   : > { %6521 = vst [vmem:[#allocation7_spill] sm:$0xff] %v5563_v24  ;;  %v240_v34 = vrot.slane %v5563_v24, 1  ;;  %v2084_v37 = vsel %vm571_vm3, %v2082_v26, %v2083_v30  ;;  %v248_v38 = vrot.slane %v5575_v31, 1  ;;  %v5597_v45 = vcombine.low %v167_v27, %v168_v40  ;;  %v171_v51 = vld [vmem:[%s5529_s30 + $0x2c] sm:$0xf] }
  0x39   : > { %v236_v36 = vor.u32 %v235_v29, %v5552_v19  ;;  %4727 = vmatprep.mubr.msk.bf16.mxu0 %vm308_vm2, %v2084_v37  ;;  %v2086_v42 = vsel %vm571_vm3, %v2083_v30, %v2085_v35  ;;  %v5594_v43 = vshll.u32 %v5577_v32, 16  ;;  %v5603_v49 = vcombine.low %v168_v40, %v169_v44  ;;  %v172_v52 = vld [vmem:[%s5529_s30 + $0x30] sm:$0xf]  ;;  %v5617_v57 = vld [vmem:[%s5529_s30 + $0x34] sm:$0xf] }
  0x3a   : > { %v244_v41 = vor.u32 %v5566_v25, %v240_v34  ;;  %4728 = vmatmul.mubr.msk.bf16.vlgmr.msra.gmra.mrb[0].mxu0 %vm308_vm2, %v2086_v42  ;;  %v252_v48 = vor.u32 %v5587_v39, %v248_v38  ;;  %v5606_v50 = vshrl.u32 %v5577_v32, 16  ;;  %v2087_v56 = vrot.slane %v5597_v45, 1  ;;  %v5620_v58 = vld [vmem:[%s5529_s30 + $0x38] sm:$0xf]  ;;  %v5630_v61 = vld [vmem:[%s5529_s30 + $0x3c] sm:$0xf] }
  0x3b   : > { %v241_v47 = vsel %vm229_vm1, %v236_v36, %v240_v34  ;;  %4744 = vmatpush3.bf16.msra.mxu0 %v5347_v14  ;;  %v256_v55 = vrot.slane %v5594_v43, 1  ;;  %v5622_v59 = vcombine.low %v170_v46, %v171_v51  ;;  %v5627_v60 = vshll.u32 %v5603_v49, 16  ;;  %v5358_v7 = vld [vmem:[#allocation2 + $0xec] ss:$0 sps:$4 sm:$0x33]  }
  0x3c   : > { %4507 = vmatprep.mubr.msk.bf16.mxu1 %vm308_vm2, %v241_v47  ;;  %v5612_v54 = vsel %vm229_vm1, %v244_v41, %v248_v38  ;;  %4745 = vmatprep.subr.bf16.mxu0 %v5348_v33  ;;  %v5633_v62 = vcombine.low %v172_v52, %v5617_v57  ;;  %v5635_v63 = vcombine.low %v169_v44, %v170_v46  ;;  %v5663_v12 = vshrl.u32 %v5548_v18, 16  ;;  %v5360_v29 = vld [vmem:[#allocation2 + $0x10] ss:$0 sps:$4 sm:$0x33]   ;;  %v5686_v36 = vld [vmem:[#allocation2 + $0x28] sm:$0xff]  }
  0x3d   : > { %6522 = vst [vmem:[#allocation8_spill] sm:$0xff] %v5612_v54  ;;  %4508 = vmatmul.mubr.msk.bf16.vlgmr.msra.gmra.mrb[0].mxu1 %vm308_vm2, %v5612_v54  ;;  %v5639_v0 = vsel %vm229_vm1, %v252_v48, %v256_v55  ;;  %v2088_v1 = vsel %vm571_vm3, %v2085_v35, %v2087_v56  ;;  %v260_v2 = vor.u32 %v5606_v50, %v256_v55  ;;  %v264_v4 = vrot.slane %v5627_v60, 1 }
  0x3e   : > { %4524 = vmatpush3.bf16.msra.mxu1 %v5533_v8  ;;  %6523 = vst [vmem:[#allocation9_spill] sm:$0xff] %v5639_v0  ;;  %v5643_v3 = vcombine.low %v171_v51, %v172_v52  ;;  %4511 = vmatprep.mubr.msk.bf16.mxu1 %vm308_vm2, %v5639_v0  ;;  %v5651_v5 = vcombine.low %v5620_v58, %v5630_v61  ;;  %v6456_v6 = vrot.slane %v5635_v63, 1  ;;  %v5655_v8 = vshrl.u32 %v5603_v49, 16 }
  0x3f   : > { %4731 = vmatprep.mubr.msk.bf16.mxu0 %vm308_vm2, %v2088_v1  ;;  %4746 = vmatpush3.bf16.msra.mxu0 %v5348_v33  ;;  %v5660_v11 = vshll.u32 %v5622_v59, 16  ;;  %v5666_v14 = vshll.u32 %v5548_v18, 16  ;;  %v5669_v16 = vshll.u32 %v5559_v22, 16  ;;  %v5672_v17 = vsel %vm229_vm1, %v260_v2, %v264_v4 }
  0x40   : > { %4525 = vmatprep.subr.bf16.mxu1 %v5357_v53  ;;  %6525 = vst [vmem:[#allocation11_spill] sm:$0xff] %v5672_v17  ;;  %v2090_v23 = vsel %vm571_vm3, %v2087_v56, %v6456_v6  ;;  %5301 = vmatprep.subr.msk.bf16.mxu0 %vm333_vm0, %v5358_v7  ;;  %v2329_v26 = vsel %vm333_vm0, %v5358_v7, 0  ;;  %v268_v27 = vor.u32 %v5655_v8, %v264_v4  ;;  %v5682_v33 = vshrl.u32 %v5559_v22, 16 }
  0x41   : > { %6524 = vst [vmem:[#allocation10_spill] sm:$0xff] %v5669_v16  ;;  %v272_v30 = vrot.slane %v5660_v11, 1  ;;  %v2258_v34 = vrot.slane %v5663_v12, 1  ;;  %v2259_v35 = vrot.slane %v5666_v14, 2  ;;  %v2262_v37 = vrot.slane %v5669_v16, 2 }
  0x42   : > { %4526 = vmatpush3.bf16.msra.mxu1 %v5357_v53  ;;  %6526 = vst [vmem:[#allocation12_spill] sm:$0xff] %v5682_v33  ;;  %4732 = vmatmul.mubr.msk.bf16.gmra.mrb[4].mxu0 %vm308_vm2, %v2090_v23  ;;  %v5691_v38 = vshrl.u32 %v5622_v59, 16  ;;  %v5694_v40 = vshll.u32 %v5633_v62, 16  ;;  %v5697_v41 = vshll.u32 %v5570_v28, 16  ;;  %v2261_v46 = vrot.slane %v5682_v33, 1 }
  0x43   : > { %5290 = vmatprep.subr.msk.bf16.mxu1 %vm333_vm0, %v5360_v29  ;;  %4748 = vmatpush3.bf16.msra.mxu0 %v2329_v26  ;;  %v5701_v42 = vsel %vm229_vm1, %v268_v27, %v272_v30  ;;  %v2260_v44 = vor.u32 %v2259_v35, %v2258_v34  ;;  %v5705_v47 = vshrl.u32 %v5570_v28, 16  ;;  %v5714_v53 = vshrl.u32 %v5633_v62, 16  ;;  %v5731_v26 = vld [vmem:[%s5529_s30 + $0x40] sm:$0xf]  ;;  %v5361_v35 = vld [vmem:[#allocation2 + $0xf8] sm:$0xff]  }
  0x44   : > { %6527 = vst [vmem:[#allocation13_spill] sm:$0xff] %v5694_v40  ;;  %6528 = vst [vmem:[#allocation14_spill] sm:$0xff] %v5697_v41  ;;  %v276_v48 = vor.u32 %v5691_v38, %v272_v30  ;;  %v280_v51 = vrot.slane %v5694_v40, 1  ;;  %v2266_v52 = vrot.slane %v5697_v41, 2  ;;  %4765 = vmatprep.subr.bf16.mxu0 %v5657_v9  ;;  %v2263_v55 = vor.u32 %v2262_v37, %v2261_v46  ;;  %v5366_v40 = vld [vmem:[#allocation2 + $0x104] sm:$0xff]  }
  0x45   : > { %6529 = vst [vmem:[#allocation15_spill] sm:$0xff] %v5701_v42  ;;  %6530 = vst [vmem:[#allocation16_spill] sm:$0xff] %v5705_v47  ;;  %4512 = vmatmul.mubr.msk.bf16.gmra.mrb[4].mxu1 %vm308_vm2, %v5672_v17  ;;  %v2265_v56 = vrot.slane %v5705_v47, 1  ;;  %v5720_v1 = vshll.u32 %v5651_v5, 16  ;;  %v466_v2 = vsel %vm333_vm0, %v5360_v29, 0  ;;  %v5725_v7 = vshll.u32 %v5597_v45, 16 }
  0x46   : > { %6531 = vst [vmem:[#allocation17_spill] sm:$0xff] %v5714_v53  ;;  %4515 = vmatprep.mubr.msk.bf16.mxu1 %vm308_vm2, %v5701_v42  ;;  %v284_v4 = vor.u32 %v5714_v53, %v280_v51  ;;  %4528 = vmatpush3.bf16.msra.mxu1 %v466_v2  ;;  %v5728_v23 = vshrl.u32 %v5597_v45, 16  ;;  %v5735_v27 = vcombine.low %v5617_v57, %v5620_v58  ;;  %v5744_v2 = vshll.u32 %v5635_v63, 16 }
  0x47   : > { %6532 = vst [vmem:[#allocation18_spill] sm:$0xff] %v5725_v7  ;;  %v2264_v30 = vsel %vm748_vm4, %v2260_v44, %v2263_v55  ;;  %v2267_v34 = vor.u32 %v2266_v52, %v2265_v56  ;;  %v288_v29 = vrot.slane %v5720_v1, 1  ;;  %4545 = vmatprep.subr.bf16.mxu1 %v5686_v36  ;;  %v2270_v46 = vrot.slane %v5725_v7, 2 }
  0x48   : > { %6533 = vst [vmem:[#allocation19_spill] sm:$0xff] %v5728_v23  ;;  %4749 = vmatprep.mubr.msk.bf16.mxu0 %vm308_vm2, %v2264_v30  ;;  %v2269_v37 = vrot.slane %v5728_v23, 1  ;;  %6534 = vst [vmem:[#allocation20_spill] sm:$0xff] %v5744_v2  ;;  %v5747_v57 = vshrl.u32 %v5635_v63, 16  ;;  %v5750_v58 = vsel %vm229_vm1, %v276_v48, %v280_v51  ;;  %v5757_v56 = vshll.u32 %v5643_v3, 16 }
  0x49   : > { %6536 = vst [vmem:[#allocation22_spill] sm:$0xff] %v5750_v58  ;;  %v2268_v44 = vsel %vm748_vm4, %v2263_v55, %v2267_v34  ;;  %v5754_v52 = vsel %vm229_vm1, %v284_v4, %v288_v29  ;;  %v5363_v30 = vld [vmem:[#allocation2 + $0x100] ss:$0 sps:$4 sm:$0x33]   ;;  %v2274_v42 = vrot.slane %v5744_v2, 2  ;;  %v5763_v17 = vshrl.u32 %v5643_v3, 16 }
  0x4a   : > { %6535 = vst [vmem:[#allocation21_spill] sm:$0xff] %v5747_v57  ;;  %6537 = vst [vmem:[#allocation23_spill] sm:$0xff] %v5754_v52  ;;  %4750 = vmatmul.mubr.msk.bf16.vlgmr.msra.gmra.mrb[0].mxu0 %vm308_vm2, %v2268_v44  ;;  %v2271_v6 = vor.u32 %v2270_v46, %v2269_v37  ;;  %v2273_v10 = vrot.slane %v5747_v57, 1  ;;  %v2278_v48 = vrot.slane %v5757_v56, 2  ;;  %v5768_v51 = vshll.u32 %v5735_v27, 16 }
  0x4b   : > { %6538 = vst [vmem:[#allocation24_spill] sm:$0xff] %v5757_v56  ;;  %6539 = vst [vmem:[#allocation25_spill] sm:$0xff] %v5763_v17  ;;  %4766 = vmatpush3.bf16.msra.mxu0 %v5657_v9  ;;  %v5771_v55 = vshrl.u32 %v5735_v27, 16  ;;  %v5775_v4 = vcombine.low %v5630_v61, %v5731_v26  ;;  %v5781_v46 = vshrl.u32 %v5651_v5, 16  ;;  %v2277_v44 = vrot.slane %v5763_v17, 1 }
  0x4c   : > { %v2272_v37 = vsel %vm748_vm4, %v2267_v34, %v2271_v6  ;;  %v2275_v9 = vor.u32 %v2274_v42, %v2273_v10  ;;  %4767 = vmatprep.subr.bf16.mxu0 %v5361_v35  ;;  %v2282_v42 = vrot.slane %v5768_v51, 2  ;;  %v2505_v54 = vsel %vm333_vm0, %v5363_v30, 0 }
  0x4d   : > { %6540 = vst [vmem:[#allocation26_spill] sm:$0xff] %v5775_v4  ;;  %4516 = vmatmul.mubr.msk.bf16.gmra.mrb[8].mxu1 %vm308_vm2, %v5750_v58  ;;  %4753 = vmatprep.mubr.msk.bf16.mxu0 %vm308_vm2, %v2272_v37  ;;  %v5788_v61 = vshll.u32 %v5775_v4, 16  ;;  %v5791_v0 = vshrl.u32 %v5775_v4, 16  ;;  %v2279_v58 = vor.u32 %v2278_v48, %v2277_v44  ;;  %v2281_v10 = vrot.slane %v5771_v55, 1 }
  0x4e   : > { %4519 = vmatprep.mubr.msk.bf16.mxu1 %vm308_vm2, %v5754_v52  ;;  %v2276_v34 = vsel %vm748_vm4, %v2271_v6, %v2275_v9  ;;  %v5798_v52 = vor.u32 %v5781_v46, %v288_v29 }
  0x4f   : > { %6541 = vst [vmem:[#allocation27_spill] sm:$0xff] %v5788_v61  ;;  %6542 = vst [vmem:[#allocation28_spill] sm:$0xff] %v5791_v0  ;;  %4768 = vmatpush3.bf16.msra.mxu0 %v5361_v35  ;;  %v2280_v37 = vsel %vm748_vm4, %v2275_v9, %v2279_v58  ;;  %v2285_v53 = vrot.slane %v5791_v0, 1  ;;  %v2286_v48 = vrot.slane %v5788_v61, 2  ;;  %v2283_v6 = vor.u32 %v2282_v42, %v2281_v10  ;;  %v5365_v9 = vld [vmem:[#allocation2 + $0x30] sm:$0xff]   ;;  %v5369_v10 = vld [vmem:[#allocation2 + $0x3c] sm:$0xff]  }
  0x50   : > { %6543 = vst [vmem:[#allocation29_spill] sm:$0xff] %v5798_v52  ;;  %5302 = vmatprep.subr.msk.bf16.mxu0 %vm333_vm0, %v5363_v30  ;;  %v2455_v42 = vrot.slane %v5597_v45, 2 }
  0x51   : > { %v2287_v35 = vor.u32 %v2286_v48, %v2285_v53  ;;  %v2284_v29 = vsel %vm748_vm4, %v2279_v58, %v2283_v6  ;;  %v2451_v53 = vrot.slane %v5559_v22, 2  ;;  %v5367_v58 = vld [vmem:[#allocation2 + $0x38] ss:$0 sps:$4 sm:$0x33]  }
  0x52   : > { %4754 = vmatmul.mubr.msk.bf16.gmra.mrb[4].mxu0 %vm308_vm2, %v2276_v34  ;;  %v627_v34 = vsel %vm333_vm0, %v5367_v58, 0 }
  0x53   : > { %4757 = vmatprep.mubr.msk.bf16.mxu0 %vm308_vm2, %v2280_v37  ;;  %4770 = vmatpush3.bf16.msra.mxu0 %v2505_v54  ;;  %v2288_v30 = vsel %vm748_vm4, %v2283_v6, %v2287_v35  ;;  %v2450_v54 = vrot.slane %v5548_v18, 2  ;;  %v5368_v6 = vld [vmem:[#allocation2 + $0x10c] sm:$0xff]  }
  0x54   : > { %4787 = vmatprep.subr.bf16.mxu0 %v5366_v40 }
  0x55   : > { %4520 = vmatmul.mubr.msk.bf16.gmra.mrb[12].mxu1 %vm308_vm2, %v5798_v52  ;;  %v2452_v44 = vsel %vm941_vm5, %v2450_v54, %v2451_v53  ;;  %v573_v54 = vrot.slane %v5544_v15, 1  ;;  %v5371_v52 = vld [vmem:[#allocation2 + $0x44] sm:$0xff]  }
  0x56   : > { %4529 = vmatprep.mubr.msk.bf16.mxu1 %vm308_vm2, %v5541_v13 }
  0x5a   : > { %4758 = vmatmul.mubr.msk.bf16.gmra.mrb[8].mxu0 %vm308_vm2, %v2284_v29  ;;  %v2459_v29 = vrot.slane %v5643_v3, 2 }
  0x5b   : > { %4761 = vmatprep.mubr.msk.bf16.mxu0 %vm308_vm2, %v2288_v30  ;;  %v5370_v30 = vld [vmem:[#allocation2 + $0x114] ss:$0 sps:$4 sm:$0x33]  }
  0x5d   : > { %4530 = vmatmul.mubr.msk.bf16.vlgmr.msra.gmra.mrb[0].mxu1 %vm308_vm2, %v5544_v15 }
  0x5e   : > { %4546 = vmatpush3.bf16.msra.mxu1 %v5686_v36  ;;  %4533 = vmatprep.mubr.msk.bf16.mxu1 %vm308_vm2, %v5557_v21  ;;  %v2453_v36 = vrot.slane %v5570_v28, 2 }
  0x5f   : > { %4547 = vmatprep.subr.bf16.mxu1 %v5365_v9 }
  0x60   : > { %v2454_v37 = vsel %vm941_vm5, %v2451_v53, %v2453_v36  ;;  %v2456_v48 = vsel %vm941_vm5, %v2453_v36, %v2455_v42  ;;  %v2461_v36 = vrot.slane %v5735_v27, 2 }
  0x62   : > { %4548 = vmatpush3.bf16.msra.mxu1 %v5365_v9  ;;  %4762 = vmatmul.mubr.msk.bf16.gmra.mrb[12].mxu0 %vm308_vm2, %v2287_v35  ;;  %v2457_v35 = vrot.slane %v5635_v63, 2  ;;  %v572_v9 = vrot.slane %v5541_v13, 1 }
  0x63   : > { %5291 = vmatprep.subr.msk.bf16.mxu1 %vm333_vm0, %v5367_v58  ;;  %4771 = vmatprep.mubr.msk.bf16.mxu0 %vm308_vm2, %v2452_v44  ;;  %v2705_v58 = vsel %vm333_vm0, %v5370_v30, 0  ;;  %v5848_v44 = vld [vmem:[#allocation2 + $0x118] sm:$0xff]  }
  0x64   : > { %v2460_v53 = vsel %vm941_vm5, %v2457_v35, %v2459_v29 }
  0x65   : > { %4534 = vmatmul.mubr.msk.bf16.gmra.mrb[4].mxu1 %vm308_vm2, %v5577_v32 }
  0x66   : > { %4537 = vmatprep.mubr.msk.bf16.mxu1 %vm308_vm2, %v5603_v49  ;;  %4550 = vmatpush3.bf16.msra.mxu1 %v627_v34  ;;  %v574_v34 = vsel %vm571_vm3, %v572_v9, %v573_v54 }
  0x67   : > { %4567 = vmatprep.subr.bf16.mxu1 %v5369_v10 }
  0x6a   : > { %4772 = vmatmul.mubr.msk.bf16.vlgmr.msra.gmra.mrb[0].mxu0 %vm308_vm2, %v2454_v37  ;;  %v575_v37 = vrot.slane %v5557_v21, 1 }
  0x6b   : > { %4788 = vmatpush3.bf16.msra.mxu0 %v5366_v40  ;;  %4775 = vmatprep.mubr.msk.bf16.mxu0 %vm308_vm2, %v2456_v48  ;;  %v2458_v40 = vsel %vm941_vm5, %v2455_v42, %v2457_v35  ;;  %v2463_v42 = vrot.slane %v5775_v4, 2  ;;  %v577_v48 = vrot.slane %v5577_v32, 1  ;;  %v2629_v35 = vrot.slane %v5663_v12, 2 }
  0x6c   : > { %4789 = vmatprep.subr.bf16.mxu0 %v5368_v6 }
  0x6d   : > { %4538 = vmatmul.mubr.msk.bf16.gmra.mrb[8].mxu1 %vm308_vm2, %v5622_v59  ;;  %v2464_v9 = vsel %vm941_vm5, %v2461_v36, %v2463_v42 }
  0x6e   : > { %4541 = vmatprep.mubr.msk.bf16.mxu1 %vm308_vm2, %v5633_v62 }
  0x6f   : > { %4790 = vmatpush3.bf16.msra.mxu0 %v5368_v6  ;;  %v2462_v6 = vsel %vm941_vm5, %v2459_v29, %v2461_v36 }
  0x70   : > { %5303 = vmatprep.subr.msk.bf16.mxu0 %vm333_vm0, %v5370_v30  ;;  %v2630_v30 = vrot.slane %v5666_v14, 3 }
  0x72   : > { %4776 = vmatmul.mubr.msk.bf16.gmra.mrb[4].mxu0 %vm308_vm2, %v2458_v40  ;;  %v2632_v40 = vrot.slane %v5682_v33, 2  ;;  %v2631_v29 = vor.u32 %v2630_v30, %v2629_v35  ;;  %v2640_v33 = vrot.slane %v5728_v23, 2  ;;  %v1149_v30 = vrot.slane %v5781_v46, 2 }
  0x73   : > { %4779 = vmatprep.mubr.msk.bf16.mxu0 %vm308_vm2, %v2460_v53  ;;  %4792 = vmatpush3.bf16.msra.mxu0 %v2705_v58  ;;  %v2633_v53 = vrot.slane %v5669_v16, 3  ;;  %v5868_v58 = vsel %vm571_vm3, %v573_v54, %v575_v37  ;;  %v579_v54 = vrot.slane %v5603_v49, 1  ;;  %v5373_v16 = vld [vmem:[#allocation2 + $0x4c] ss:$0 sps:$4 sm:$0x33]   ;;  %v5913_v23 = vrot.slane %v5651_v5, 1 }
  0x74   : > { %4809 = vmatprep.subr.bf16.mxu0 %v5848_v44  ;;  %6544 = vst [vmem:[#allocation30_spill] sm:$0xff] %v5868_v58 }
  0x75   : > { %4542 = vmatmul.mubr.msk.bf16.gmra.mrb[12].mxu1 %vm308_vm2, %v5651_v5  ;;  %v2634_v36 = vor.u32 %v2633_v53, %v2632_v40  ;;  %v1150_v40 = vrot.slane %v5720_v1, 3  ;;  %v5889_v53 = vsel %vm571_vm3, %v577_v48, %v579_v54 }
  0x76   : > { %4551 = vmatprep.mubr.msk.bf16.mxu1 %vm308_vm2, %v574_v34  ;;  %v5872_v34 = vsel %vm571_vm3, %v575_v37, %v577_v48  ;;  %v581_v37 = vrot.slane %v5622_v59, 1  ;;  %6546 = vst [vmem:[#allocation32_spill] sm:$0xff] %v5889_v53 }
  0x77   : > { %6545 = vst [vmem:[#allocation31_spill] sm:$0xff] %v5872_v34  ;;  %v2635_v35 = vsel %vm1121_vm6, %v2631_v29, %v2634_v36  ;;  %v820_v29 = vsel %vm333_vm0, %v5373_v16, 0 }
  0x7a   : > { %4780 = vmatmul.mubr.msk.bf16.gmra.mrb[8].mxu0 %vm308_vm2, %v2462_v6  ;;  %v2636_v6 = vrot.slane %v5705_v47, 2 }
  0x7b   : > { %4783 = vmatprep.mubr.msk.bf16.mxu0 %vm308_vm2, %v2464_v9  ;;  %v2637_v9 = vrot.slane %v5697_v41, 3  ;;  %v177_v41 = vld [vmem:[%s5529_s30 + $0x44] sm:$0xf] }
  0x7d   : > { %4552 = vmatmul.mubr.msk.bf16.vlgmr.msra.gmra.mrb[0].mxu1 %vm308_vm2, %v5868_v58  ;;  %v5897_v58 = vld [vmem:[#allocation2 + $0x50] sm:$0xff]   ;;  %v2638_v48 = vor.u32 %v2637_v9, %v2636_v6 }
  0x7e   : > { %4568 = vmatpush3.bf16.msra.mxu1 %v5369_v10  ;;  %4555 = vmatprep.mubr.msk.bf16.mxu1 %vm308_vm2, %v5872_v34  ;;  %v2641_v10 = vrot.slane %v5725_v7, 3  ;;  %v5893_v34 = vsel %vm571_vm3, %v579_v54, %v581_v37  ;;  %v5901_v7 = vcombine.low %v5731_v26, %v5731_v26 }
  0x7f   : > { %4569 = vmatprep.subr.bf16.mxu1 %v5371_v52  ;;  %6547 = vst [vmem:[#allocation33_spill] sm:$0xff] %v5893_v34  ;;  %v2639_v9 = vsel %vm1121_vm6, %v2634_v36, %v2638_v48 }
  0x80   : > { %v6483_v54 = vshll.u32 %v5901_v7, 16 }
  0x82   : > { %4570 = vmatpush3.bf16.msra.mxu1 %v5371_v52  ;;  %4784 = vmatmul.mubr.msk.bf16.gmra.mrb[12].mxu0 %vm308_vm2, %v2463_v42  ;;  %v2642_v52 = vor.u32 %v2641_v10, %v2640_v33  ;;  %v5906_v42 = vor.u32 %v1150_v40, %v1149_v30  ;;  %v1156_v6 = vrot.slane %v6483_v54, 3  ;;  %v5920_v33 = vcombine.low %v5731_v26, %v177_v41  ;;  %v5374_v40 = vld [vmem:[#allocation2 + $0x120] sm:$0xff]  }
  0x83   : > { %5292 = vmatprep.subr.msk.bf16.mxu1 %vm333_vm0, %v5373_v16  ;;  %4793 = vmatprep.mubr.msk.bf16.mxu0 %vm308_vm2, %v2635_v35  ;;  %v583_v16 = vrot.slane %v5633_v62, 1  ;;  %v2644_v35 = vrot.slane %v5747_v57, 2  ;;  %v2645_v10 = vrot.slane %v5744_v2, 3  ;;  %v750_v54 = vrot.slane %v5555_v20, 2 }
  0x84   : > { %6548 = vst [vmem:[#allocation34_spill] sm:$0xff] %v5906_v42  ;;  %6549 = vst [vmem:[#allocation35_spill] sm:$0xff] %v5920_v33  ;;  %v2643_v30 = vsel %vm1121_vm6, %v2638_v48, %v2642_v52  ;;  %v749_v48 = vrot.slane %v5552_v19, 1  ;;  %v752_v33 = vrot.slane %v5566_v25, 1 }
  0x85   : > { %4556 = vmatmul.mubr.msk.bf16.gmra.mrb[4].mxu1 %vm308_vm2, %v5889_v53  ;;  %v5930_v53 = vsel %vm1121_vm6, %v5906_v42, %v1156_v6  ;;  %v5933_v26 = vsel %vm571_vm3, %v581_v37, %v583_v16  ;;  %v5937_v36 = vsel %vm571_vm3, %v583_v16, %v5913_v23  ;;  %v2646_v37 = vor.u32 %v2645_v10, %v2644_v35  ;;  %v5376_v6 = vld [vmem:[#allocation2 + $0x128] ss:$0 sps:$4 sm:$0x33]  }
  0x86   : > { %4559 = vmatprep.mubr.msk.bf16.mxu1 %vm308_vm2, %v5893_v34  ;;  %4572 = vmatpush3.bf16.msra.mxu1 %v820_v29  ;;  %v2648_v29 = vrot.slane %v5763_v17, 2  ;;  %v2649_v34 = vrot.slane %v5757_v56, 3  ;;  %6550 = vst [vmem:[#allocation36_spill] sm:$0xff] %v5930_v53  ;;  %6551 = vst [vmem:[#allocation37_spill] sm:$0xff] %v5933_v26  ;;  %v753_v56 = vrot.slane %v5563_v24, 2  ;;  %v1335_v53 = vrot.slane %v5901_v7, 3 }
  0x87   : > { %4589 = vmatprep.subr.bf16.mxu1 %v5897_v58  ;;  %6552 = vst [vmem:[#allocation38_spill] sm:$0xff] %v5937_v36  ;;  %v751_v42 = vor.u32 %v750_v54, %v749_v48  ;;  %v2652_v35 = vrot.slane %v5771_v55, 2  ;;  %v2653_v10 = vrot.slane %v5768_v51, 3  ;;  %v2656_v54 = vrot.slane %v5791_v0, 2 }
  0x88   : > { %v2650_v16 = vor.u32 %v2649_v34, %v2648_v29  ;;  %v754_v24 = vor.u32 %v753_v56, %v752_v33  ;;  %v2657_v56 = vrot.slane %v5788_v61, 3  ;;  %v5965_v33 = vld [vmem:[#allocation2 + $0x12c] sm:$0xff]   ;;  %v757_v29 = vrot.slane %v5575_v31, 2 }
  0x89   : > { %v760_v48 = vrot.slane %v5606_v50, 1 }
  0x8a   : > { %4794 = vmatmul.mubr.msk.bf16.vlgmr.msra.gmra.mrb[0].mxu0 %vm308_vm2, %v2639_v9  ;;  %v6490_v9 = vrot.slane %v5651_v5, 3 }
  0x8b   : > { %4810 = vmatpush3.bf16.msra.mxu0 %v5848_v44  ;;  %4797 = vmatprep.mubr.msk.bf16.mxu0 %vm308_vm2, %v2643_v30  ;;  %v2647_v44 = vsel %vm1121_vm6, %v2642_v52, %v2646_v37  ;;  %v2651_v30 = vsel %vm1121_vm6, %v2646_v37, %v2650_v16  ;;  %v2883_v52 = vsel %vm333_vm0, %v5376_v6, 0  ;;  %v761_v37 = vrot.slane %v5594_v43, 2 }
  0x8c   : > { %4811 = vmatprep.subr.bf16.mxu0 %v5374_v40  ;;  %v5958_v34 = vsel %vm1319_vm7, %v6490_v9, %v1335_v53  ;;  %v755_v53 = vsel %vm748_vm4, %v751_v42, %v754_v24  ;;  %v2654_v9 = vor.u32 %v2653_v10, %v2652_v35  ;;  %v765_v10 = vrot.slane %v5627_v60, 2 }
  0x8d   : > { %4560 = vmatmul.mubr.msk.bf16.gmra.mrb[8].mxu1 %vm308_vm2, %v5933_v26  ;;  %6553 = vst [vmem:[#allocation39_spill] sm:$0xff] %v5958_v34  ;;  %v762_v42 = vor.u32 %v761_v37, %v760_v48 }
  0x8e   : > { %4563 = vmatprep.mubr.msk.bf16.mxu1 %vm308_vm2, %v5937_v36  ;;  %v5974_v36 = vcombine.low %v177_v41, %v177_v41  ;;  %v2655_v26 = vsel %vm1121_vm6, %v2650_v16, %v2654_v9  ;;  %v764_v41 = vrot.slane %v5655_v8, 1  ;;  %v769_v16 = vrot.slane %v5660_v11, 2 }
  0x8f   : > { %4812 = vmatpush3.bf16.msra.mxu0 %v5374_v40  ;;  %v756_v40 = vrot.slane %v5587_v39, 1 }
  0x90   : > { %5304 = vmatprep.subr.msk.bf16.mxu0 %vm333_vm0, %v5376_v6  ;;  %v2658_v6 = vor.u32 %v2657_v56, %v2656_v54  ;;  %v6493_v34 = vshll.u32 %v5974_v36, 16  ;;  %v5378_v56 = vld [vmem:[#allocation2 + $0x58] sm:$0xff]  }
  0x92   : > { %4798 = vmatmul.mubr.msk.bf16.gmra.mrb[4].mxu0 %vm308_vm2, %v2647_v44  ;;  %v758_v44 = vor.u32 %v757_v29, %v756_v40  ;;  %v766_v40 = vor.u32 %v765_v10, %v764_v41  ;;  %v776_v41 = vrot.slane %v5781_v46, 1 }
  0x93   : > { %4801 = vmatprep.mubr.msk.bf16.mxu0 %vm308_vm2, %v2651_v30  ;;  %4814 = vmatpush3.bf16.msra.mxu0 %v2883_v52  ;;  %v2659_v30 = vsel %vm1121_vm6, %v2654_v9, %v2658_v6  ;;  %v768_v52 = vrot.slane %v5691_v38, 1  ;;  %v2826_v9 = vrot.slane %v5548_v18, 3 }
  0x94   : > { %4831 = vmatprep.subr.bf16.mxu0 %v5965_v33  ;;  %v5984_v35 = vsel %vm748_vm4, %v754_v24, %v758_v44  ;;  %v5990_v54 = vsel %vm748_vm4, %v758_v44, %v762_v42  ;;  %v2663_v24 = vrot.slane %v6493_v34, 3  ;;  %v6007_v44 = vsel %vm748_vm4, %v762_v42, %v766_v40  ;;  %v6019_v42 = vld [vmem:[#allocation2 + $0x64] sm:$0xff]  }
  0x95   : > { %4564 = vmatmul.mubr.msk.bf16.gmra.mrb[12].mxu1 %vm308_vm2, %v5913_v23  ;;  %6554 = vst [vmem:[#allocation40_spill] sm:$0xff] %v5984_v35  ;;  %v770_v29 = vor.u32 %v769_v16, %v768_v52  ;;  %v2831_v52 = vrot.slane %v5597_v45, 3 }
  0x96   : > { %4573 = vmatprep.mubr.msk.bf16.mxu1 %vm308_vm2, %v755_v53  ;;  %v5380_v53 = vld [vmem:[#allocation2 + $0x60] ss:$0 sps:$4 sm:$0x33]   ;;  %v2664_v48 = vsel %vm1121_vm6, %v2658_v6, %v2663_v24  ;;  %v777_v6 = vrot.slane %v5720_v1, 2 }
  0x97   : > { %v997_v10 = vsel %vm333_vm0, %v5380_v53, 0 }
  0x98   : > { %v6028_v24 = vor.u32 %v777_v6, %v776_v41  ;;  %v1527_v41 = vrot.slane %v5720_v1, 4  ;;  %v6561_v6 = vshll.u32 %v5901_v7, 16 }
  0x9a   : > { %4802 = vmatmul.mubr.msk.bf16.gmra.mrb[8].mxu0 %vm308_vm2, %v2655_v26  ;;  %v2827_v26 = vrot.slane %v5559_v22, 3 }
  0x9b   : > { %4805 = vmatprep.mubr.msk.bf16.mxu0 %vm308_vm2, %v2659_v30  ;;  %v6555_v30 = vld [vmem:[#allocation17_spill] sm:$0xff] }
  0x9c   : > { %v2828_v37 = vsel %vm1319_vm7, %v2826_v9, %v2827_v26  ;;  %v772_v34 = vrot.slane %v6555_v30, 1 }
  0x9d   : > { %4574 = vmatmul.mubr.msk.bf16.vlgmr.msra.gmra.mrb[0].mxu1 %vm308_vm2, %v5984_v35  ;;  %v6556_v35 = vld [vmem:[#allocation13_spill] sm:$0xff] }
  0x9e   : > { %4590 = vmatpush3.bf16.msra.mxu1 %v5897_v58  ;;  %4577 = vmatprep.mubr.msk.bf16.mxu1 %vm308_vm2, %v5990_v54  ;;  %v773_v22 = vrot.slane %v6556_v35, 2  ;;  %v6013_v58 = vsel %vm748_vm4, %v766_v40, %v770_v29  ;;  %6558 = vst [vmem:[#allocation13_spill] sm:$0xff] %v6028_v24 }
  0x9f   : > { %4591 = vmatprep.subr.bf16.mxu1 %v5378_v56  ;;  %6557 = vst [vmem:[#allocation17_spill] sm:$0xff] %v6013_v58 }
  0xa0   : > { %v774_v16 = vor.u32 %v773_v22, %v772_v34  ;;  %v2833_v22 = vrot.slane %v5635_v63, 3  ;;  %v2835_v34 = vrot.slane %v5643_v3, 3 }
  0xa2   : > { %4592 = vmatpush3.bf16.msra.mxu1 %v5378_v56  ;;  %4806 = vmatmul.mubr.msk.bf16.gmra.mrb[12].mxu0 %vm308_vm2, %v2664_v48  ;;  %v2829_v56 = vrot.slane %v5570_v28, 3  ;;  %v6034_v48 = vsel %vm748_vm4, %v770_v29, %v774_v16  ;;  %v1526_v29 = vrot.slane %v5781_v46, 3  ;;  %v2836_v1 = vsel %vm1319_vm7, %v2833_v22, %v2835_v34 }
  0xa3   : > { %5293 = vmatprep.subr.msk.bf16.mxu1 %vm333_vm0, %v5380_v53  ;;  %4815 = vmatprep.mubr.msk.bf16.mxu0 %vm308_vm2, %v2828_v37  ;;  %v5381_v53 = vld [vmem:[#allocation2 + $0x134] sm:$0xff]   ;;  %6559 = vst [vmem:[#allocation41_spill] sm:$0xff] %v6034_v48  ;;  %v6039_v37 = vsel %vm748_vm4, %v774_v16, %v6028_v24  ;;  %v943_v16 = vrot.slane %v5544_v15, 2 }
  0xa4   : > { %v2830_v9 = vsel %vm1319_vm7, %v2827_v26, %v2829_v56  ;;  %v2832_v40 = vsel %vm1319_vm7, %v2829_v56, %v2831_v52  ;;  %6560 = vst [vmem:[#allocation42_spill] sm:$0xff] %v6039_v37  ;;  %v5383_v26 = vld [vmem:[#allocation2 + $0x13c] ss:$0 sps:$4 sm:$0x33]   ;;  %v942_v56 = vrot.slane %v5541_v13, 2 }
  0xa5   : > { %4578 = vmatmul.mubr.msk.bf16.gmra.mrb[4].mxu1 %vm308_vm2, %v6007_v44 }
  0xa6   : > { %4581 = vmatprep.mubr.msk.bf16.mxu1 %vm308_vm2, %v6013_v58  ;;  %4594 = vmatpush3.bf16.msra.mxu1 %v997_v10  ;;  %v1533_v10 = vrot.slane %v6561_v6, 4  ;;  %v944_v6 = vsel %vm941_vm5, %v942_v56, %v943_v16  ;;  %v6562_v56 = vld [vmem:[#allocation12_spill] sm:$0xff]  ;;  %v6566_v58 = vld [vmem:[#allocation14_spill] sm:$0xff] }
  0xa7   : > { %4611 = vmatprep.subr.bf16.mxu1 %v6019_v42 }
  0xaa   : > { %4816 = vmatmul.mubr.msk.bf16.vlgmr.msra.gmra.mrb[0].mxu0 %vm308_vm2, %v2830_v9  ;;  %v2834_v9 = vsel %vm1319_vm7, %v2831_v52, %v2833_v22  ;;  %v2837_v52 = vrot.slane %v5735_v27, 3 }
  0xab   : > { %4832 = vmatpush3.bf16.msra.mxu0 %v5965_v33  ;;  %4819 = vmatprep.mubr.msk.bf16.mxu0 %vm308_vm2, %v2832_v40  ;;  %v1530_v33 = vshrl.u32 %v5901_v7, 16  ;;  %v6057_v40 = vor.u32 %v1527_v41, %v1526_v29  ;;  %v947_v29 = vrot.slane %v5577_v32, 2 }
  0xac   : > { %4833 = vmatprep.subr.bf16.mxu0 %v5381_v53  ;;  %v2838_v41 = vsel %vm1319_vm7, %v2835_v34, %v2837_v52  ;;  %v2841_v34 = vrot.slane %v5974_v36, 3 }
  0xad   : > { %4582 = vmatmul.mubr.msk.bf16.gmra.mrb[8].mxu1 %vm308_vm2, %v6034_v48  ;;  %v1532_v46 = vrot.slane %v1530_v33, 3  ;;  %v6062_v48 = vld [vmem:[#allocation2 + $0x140] sm:$0xff]  }
  0xae   : > { %4585 = vmatprep.mubr.msk.bf16.mxu1 %vm308_vm2, %v6039_v37  ;;  %v3081_v37 = vsel %vm333_vm0, %v5383_v26, 0 }
  0xaf   : > { %4834 = vmatpush3.bf16.msra.mxu0 %v5381_v53  ;;  %v1534_v7 = vor.u32 %v1533_v10, %v1532_v46  ;;  %v2839_v53 = vrot.slane %v5775_v4, 3  ;;  %v3005_v10 = vrot.slane %v5666_v14, 4  ;;  %v6563_v46 = vld [vmem:[#allocation10_spill] sm:$0xff]  ;;  %v3011_v4 = vrot.slane %v5705_v47, 3 }
  0xb0   : > { %5305 = vmatprep.subr.msk.bf16.mxu0 %vm333_vm0, %v5383_v26  ;;  %v945_v26 = vrot.slane %v5557_v21, 2  ;;  %v3027_v47 = vrot.slane %v5771_v55, 3 }
  0xb1   : > { %v6071_v22 = vsel %vm1498_vm8, %v6057_v40, %v1534_v7  ;;  %v2840_v33 = vsel %vm1319_vm7, %v2837_v52, %v2839_v53 }
  0xb2   : > { %4820 = vmatmul.mubr.msk.bf16.gmra.mrb[4].mxu0 %vm308_vm2, %v2834_v9  ;;  %v3007_v9 = vrot.slane %v6562_v56, 3  ;;  %v6086_v7 = vsel %vm941_vm5, %v943_v16, %v945_v26  ;;  %v949_v16 = vrot.slane %v5603_v49, 2 }
  0xb3   : > { %4823 = vmatprep.mubr.msk.bf16.mxu0 %vm308_vm2, %v2836_v1  ;;  %4836 = vmatpush3.bf16.msra.mxu0 %v3081_v37  ;;  %v3004_v37 = vrot.slane %v5663_v12, 3  ;;  %v3008_v1 = vrot.slane %v6563_v46, 4  ;;  %6564 = vst [vmem:[#allocation43_spill] sm:$0xff] %v6086_v7  ;;  %v3012_v46 = vrot.slane %v6566_v58, 4 }
  0xb4   : > { %4853 = vmatprep.subr.bf16.mxu0 %v6062_v48 }
  0xb5   : > { %4586 = vmatmul.mubr.msk.bf16.gmra.mrb[12].mxu1 %vm308_vm2, %v6028_v24  ;;  %v5384_v24 = vld [vmem:[#allocation2 + $0x6c] sm:$0xff]   ;;  %v3006_v52 = vor.u32 %v3005_v10, %v3004_v37  ;;  %v3009_v56 = vor.u32 %v3008_v1, %v3007_v9  ;;  %v6567_v10 = vld [vmem:[#allocation19_spill] sm:$0xff] }
  0xb6   : > { %4595 = vmatprep.mubr.msk.bf16.mxu1 %vm308_vm2, %v944_v6  ;;  %v6090_v6 = vsel %vm941_vm5, %v945_v26, %v947_v29  ;;  %v951_v26 = vrot.slane %v5622_v59, 2  ;;  %v3015_v9 = vrot.slane %v6567_v10, 3  ;;  %v6574_v10 = vld [vmem:[#allocation7_spill] sm:$0xff] }
  0xb7   : > { %6565 = vst [vmem:[#allocation44_spill] sm:$0xff] %v6090_v6  ;;  %v3010_v37 = vsel %vm1498_vm8, %v3006_v52, %v3009_v56  ;;  %v3013_v52 = vor.u32 %v3012_v46, %v3011_v4  ;;  %v3020_v4 = vrot.slane %v5744_v2, 4  ;;  %v1126_v2 = vrot.slane %v6574_v10, 3 }
  0xba   : > { %4824 = vmatmul.mubr.msk.bf16.gmra.mrb[8].mxu0 %vm308_vm2, %v2838_v41  ;;  %v5386_v41 = vld [vmem:[#allocation2 + $0x74] ss:$0 sps:$4 sm:$0x33]  }
  0xbb   : > { %4827 = vmatprep.mubr.msk.bf16.mxu0 %vm308_vm2, %v2840_v33  ;;  %v2842_v33 = vsel %vm1319_vm7, %v2839_v53, %v2841_v34  ;;  %v1198_v53 = vsel %vm333_vm0, %v5386_v41, 0  ;;  %v6116_v34 = vld [vmem:[#allocation2 + $0x78] sm:$0xff]  }
  0xbd   : > { %4596 = vmatmul.mubr.msk.bf16.vlgmr.msra.gmra.mrb[0].mxu1 %vm308_vm2, %v6086_v7  ;;  %v6112_v7 = vsel %vm941_vm5, %v949_v16, %v951_v26 }
  0xbe   : > { %4612 = vmatpush3.bf16.msra.mxu1 %v6019_v42  ;;  %4599 = vmatprep.mubr.msk.bf16.mxu1 %vm308_vm2, %v6090_v6  ;;  %v6568_v42 = vld [vmem:[#allocation18_spill] sm:$0xff]  ;;  %v6108_v6 = vsel %vm941_vm5, %v947_v29, %v949_v16  ;;  %6570 = vst [vmem:[#allocation45_spill] sm:$0xff] %v6112_v7  ;;  %v6125_v16 = vrot.slane %v5651_v5, 2 }
  0xbf   : > { %4613 = vmatprep.subr.bf16.mxu1 %v5384_v24  ;;  %v3016_v1 = vrot.slane %v6568_v42, 4  ;;  %6569 = vst [vmem:[#allocation14_spill] sm:$0xff] %v6108_v6 }
  0xc1   : > { %v3017_v29 = vor.u32 %v3016_v1, %v3015_v9  ;;  %v3023_v9 = vrot.slane %v5763_v17, 3  ;;  %v6571_v1 = vld [vmem:[#allocation24_spill] sm:$0xff]  ;;  %v5389_v17 = vld [vmem:[#allocation2 + $0x150] ss:$0 sps:$4 sm:$0x33]  }
  0xc2   : > { %4614 = vmatpush3.bf16.msra.mxu1 %v5384_v24  ;;  %4828 = vmatmul.mubr.msk.bf16.gmra.mrb[12].mxu0 %vm308_vm2, %v2842_v33  ;;  %v953_v24 = vrot.slane %v5633_v62, 2  ;;  %v3019_v33 = vrot.slane %v5747_v57, 3  ;;  %v1123_v57 = vrot.slane %v5555_v20, 3 }
  0xc3   : > { %5294 = vmatprep.subr.msk.bf16.mxu1 %vm333_vm0, %v5386_v41  ;;  %4837 = vmatprep.mubr.msk.bf16.mxu0 %vm308_vm2, %v3010_v37  ;;  %v3014_v41 = vsel %vm1498_vm8, %v3009_v56, %v3013_v52  ;;  %v3018_v46 = vsel %vm1498_vm8, %v3013_v52, %v3017_v29  ;;  %v5387_v37 = vld [vmem:[#allocation2 + $0x148] sm:$0xff]   ;;  %v1122_v56 = vrot.slane %v5552_v19, 2  ;;  %v1125_v52 = vrot.slane %v5566_v25, 2 }
  0xc5   : > { %4600 = vmatmul.mubr.msk.bf16.gmra.mrb[4].mxu1 %vm308_vm2, %v6108_v6  ;;  %v6135_v6 = vsel %vm941_vm5, %v951_v26, %v953_v24  ;;  %v3021_v26 = vor.u32 %v3020_v4, %v3019_v33  ;;  %v3031_v4 = vrot.slane %v5791_v0, 3  ;;  %v6575_v0 = vshll.u32 %v5974_v36, 16 }
  0xc6   : > { %4603 = vmatprep.mubr.msk.bf16.mxu1 %vm308_vm2, %v6112_v7  ;;  %4616 = vmatpush3.bf16.msra.mxu1 %v1198_v53  ;;  %v3024_v7 = vrot.slane %v6571_v1, 4  ;;  %6572 = vst [vmem:[#allocation46_spill] sm:$0xff] %v6135_v6  ;;  %v6139_v53 = vsel %vm941_vm5, %v953_v24, %v6125_v16  ;;  %v1127_v1 = vor.u32 %v1126_v2, %v1125_v52  ;;  %v1129_v2 = vrot.slane %v5587_v39, 2 }
  0xc7   : > { %4633 = vmatprep.subr.bf16.mxu1 %v6116_v34  ;;  %6573 = vst [vmem:[#allocation47_spill] sm:$0xff] %v6139_v53  ;;  %v3022_v42 = vsel %vm1498_vm8, %v3017_v29, %v3021_v26 }
  0xc8   : > { %v3025_v24 = vor.u32 %v3024_v7, %v3023_v9  ;;  %v3032_v7 = vrot.slane %v5788_v61, 4  ;;  %v5391_v9 = vld [vmem:[#allocation2 + $0x154] sm:$0xff]   ;;  %v3038_v61 = vrot.slane %v6575_v0, 4 }
  0xca   : > { %4838 = vmatmul.mubr.msk.bf16.vlgmr.msra.gmra.mrb[0].mxu0 %vm308_vm2, %v3014_v41  ;;  %v1124_v41 = vor.u32 %v1123_v57, %v1122_v56  ;;  %v3026_v33 = vsel %vm1498_vm8, %v3021_v26, %v3025_v24  ;;  %v1130_v57 = vrot.slane %v5575_v31, 3  ;;  %v1134_v56 = vrot.slane %v5594_v43, 3 }
  0xcb   : > { %4854 = vmatpush3.bf16.msra.mxu0 %v6062_v48  ;;  %4841 = vmatprep.mubr.msk.bf16.mxu0 %vm308_vm2, %v3018_v46  ;;  %v3028_v48 = vrot.slane %v5768_v51, 4  ;;  %v3222_v46 = vsel %vm333_vm0, %v5389_v17, 0  ;;  %v3035_v26 = vshrl.u32 %v5974_v36, 16 }
  0xcc   : > { %4855 = vmatprep.subr.bf16.mxu0 %v5387_v37  ;;  %v1128_v29 = vsel %vm1121_vm6, %v1124_v41, %v1127_v1 }
  0xcd   : > { %4604 = vmatmul.mubr.msk.bf16.gmra.mrb[8].mxu1 %vm308_vm2, %v6135_v6  ;;  %v3029_v52 = vor.u32 %v3028_v48, %v3027_v47  ;;  %v3037_v6 = vrot.slane %v3035_v26, 3  ;;  %v5394_v26 = vld [vmem:[#allocation2 + $0x15c] sm:$0xff]  }
  0xce   : > { %4607 = vmatprep.mubr.msk.bf16.mxu1 %vm308_vm2, %v6139_v53 }
  0xcf   : > { %4856 = vmatpush3.bf16.msra.mxu0 %v5387_v37  ;;  %v1133_v37 = vrot.slane %v5606_v50, 2  ;;  %v3030_v41 = vsel %vm1498_vm8, %v3025_v24, %v3029_v52  ;;  %v1142_v24 = vrot.slane %v5660_v11, 3  ;;  %v3039_v0 = vor.u32 %v3038_v61, %v3037_v6 }
  0xd0   : > { %5306 = vmatprep.subr.msk.bf16.mxu0 %vm333_vm0, %v5389_v17  ;;  %v3033_v17 = vor.u32 %v3032_v7, %v3031_v4  ;;  %v5390_v7 = vld [vmem:[#allocation2 + $0x80] sm:$0xff]  }
  0xd1   : > { %v1135_v53 = vor.u32 %v1134_v56, %v1133_v37  ;;  %v1145_v56 = vrot.slane %v6555_v30, 2 }
  0xd2   : > { %4842 = vmatmul.mubr.msk.bf16.gmra.mrb[4].mxu0 %vm308_vm2, %v3022_v42  ;;  %v1131_v42 = vor.u32 %v1130_v57, %v1129_v2  ;;  %v3034_v47 = vsel %vm1498_vm8, %v3029_v52, %v3033_v17  ;;  %v1141_v2 = vrot.slane %v5691_v38, 2  ;;  %v5392_v57 = vld [vmem:[#allocation2 + $0x88] ss:$0 sps:$4 sm:$0x33]   ;;  %v1146_v52 = vrot.slane %v6556_v35, 3 }
  0xd3   : > { %4845 = vmatprep.mubr.msk.bf16.mxu0 %vm308_vm2, %v3026_v33  ;;  %4858 = vmatpush3.bf16.msra.mxu0 %v3222_v46  ;;  %v1137_v33 = vrot.slane %v5655_v8, 2  ;;  %v1138_v46 = vrot.slane %v5627_v60, 3  ;;  %v1377_v6 = vsel %vm333_vm0, %v5392_v57, 0 }
  0xd4   : > { %4875 = vmatprep.subr.bf16.mxu0 %v5391_v9  ;;  %v1132_v48 = vsel %vm1121_vm6, %v1127_v1, %v1131_v42  ;;  %v1136_v4 = vsel %vm1121_vm6, %v1131_v42, %v1135_v53  ;;  %v1143_v1 = vor.u32 %v1142_v24, %v1141_v2  ;;  %v6576_v42 = vld [vmem:[#allocation34_spill] sm:$0xff] }
  0xd5   : > { %4608 = vmatmul.mubr.msk.bf16.gmra.mrb[12].mxu1 %vm308_vm2, %v6125_v16  ;;  %v1139_v36 = vor.u32 %v1138_v46, %v1137_v33  ;;  %v1321_v33 = vrot.slane %v5544_v15, 3 }
  0xd6   : > { %4617 = vmatprep.mubr.msk.bf16.mxu1 %vm308_vm2, %v1128_v29  ;;  %v3040_v29 = vsel %vm1498_vm8, %v3033_v17, %v3039_v0  ;;  %v5398_v0 = vld [vmem:[#allocation2 + $0x94] sm:$0xff]  }
  0xd7   : > { %v1140_v37 = vsel %vm1121_vm6, %v1135_v53, %v1139_v36  ;;  %v1144_v61 = vsel %vm1121_vm6, %v1139_v36, %v1143_v1  ;;  %v1147_v53 = vor.u32 %v1146_v52, %v1145_v56  ;;  %v5400_v36 = vld [vmem:[#allocation2 + $0x9c] ss:$0 sps:$4 sm:$0x33]   ;;  %v5402_v56 = vld [vmem:[#allocation2 + $0xa0] sm:$0xff]  }
  0xd8   : > { %v6579_v52 = vld [vmem:[#allocation8_spill] sm:$0xff] }
  0xd9   : > { %v1148_v17 = vsel %vm1121_vm6, %v1143_v1, %v1147_v53 }
  0xda   : > { %4846 = vmatmul.mubr.msk.bf16.gmra.mrb[8].mxu0 %vm308_vm2, %v3030_v41  ;;  %v1152_v41 = vsel %vm1121_vm6, %v1147_v53, %v6576_v42  ;;  %v6581_v53 = vld [vmem:[#allocation9_spill] sm:$0xff]  ;;  %v1502_v42 = vrot.slane %v5566_v25, 3  ;;  %v5405_v25 = vld [vmem:[#allocation2 + $0x17c] sm:$0xff]  }
  0xdb   : > { %4849 = vmatprep.mubr.msk.bf16.mxu0 %vm308_vm2, %v3034_v47  ;;  %v5396_v47 = vld [vmem:[#allocation2 + $0x164] ss:$0 sps:$4 sm:$0x33]  }
  0xdc   : > { %v3372_v46 = vsel %vm333_vm0, %v5396_v47, 0 }
  0xdd   : > { %4618 = vmatmul.mubr.msk.bf16.vlgmr.msra.gmra.mrb[0].mxu1 %vm308_vm2, %v1132_v48  ;;  %v1320_v48 = vrot.slane %v5541_v13, 3  ;;  %v1323_v13 = vrot.slane %v5557_v21, 3 }
  0xde   : > { %4634 = vmatpush3.bf16.msra.mxu1 %v6116_v34  ;;  %4621 = vmatprep.mubr.msk.bf16.mxu1 %vm308_vm2, %v1136_v4  ;;  %v5395_v34 = vld [vmem:[#allocation2 + $0x8c] sm:$0xff]  }
  0xdf   : > { %4635 = vmatprep.subr.bf16.mxu1 %v5390_v7  ;;  %v5399_v4 = vld [vmem:[#allocation2 + $0x168] sm:$0xff]   ;;  %v1324_v2 = vsel %vm1319_vm7, %v1321_v33, %v1323_v13 }
  0xe2   : > { %4636 = vmatpush3.bf16.msra.mxu1 %v5390_v7  ;;  %4850 = vmatmul.mubr.msk.bf16.gmra.mrb[12].mxu0 %vm308_vm2, %v3040_v29  ;;  %v6577_v7 = vld [vmem:[#allocation36_spill] sm:$0xff] }
  0xe3   : > { %5295 = vmatprep.subr.msk.bf16.mxu1 %vm333_vm0, %v5392_v57  ;;  %4859 = vmatprep.mubr.msk.bf16.mxu0 %vm308_vm2, %v5544_v15  ;;  %v1325_v15 = vrot.slane %v5577_v32, 3  ;;  %v6578_v57 = vld [vmem:[#allocation35_spill] sm:$0xff] }
  0xe5   : > { %4622 = vmatmul.mubr.msk.bf16.gmra.mrb[4].mxu1 %vm308_vm2, %v1140_v37  ;;  %v1326_v24 = vsel %vm1319_vm7, %v1323_v13, %v1325_v15  ;;  %v1576_v37 = vsel %vm333_vm0, %v5400_v36, 0  ;;  %v6584_v13 = vld [vmem:[#allocation22_spill] sm:$0xff] }
  0xe6   : > { %4625 = vmatprep.mubr.msk.bf16.mxu1 %vm308_vm2, %v1144_v61  ;;  %4638 = vmatpush3.bf16.msra.mxu1 %v1377_v6  ;;  %v6580_v6 = vrot.slane %v5651_v5, 3 }
  0xe7   : > { %4655 = vmatprep.subr.bf16.mxu1 %v5395_v34 }
  0xea   : > { %4860 = vmatmul.mubr.msk.bf16.vlgmr.msra.gmra.mrb[0].mxu0 %vm308_vm2, %v5557_v21  ;;  %v1327_v21 = vrot.slane %v5603_v49, 3 }
  0xeb   : > { %4876 = vmatpush3.bf16.msra.mxu0 %v5391_v9  ;;  %4863 = vmatprep.mubr.msk.bf16.mxu0 %vm308_vm2, %v5577_v32  ;;  %v1322_v9 = vsel %vm1319_vm7, %v1320_v48, %v1321_v33  ;;  %v1329_v32 = vrot.slane %v5622_v59, 3  ;;  %v1507_v33 = vrot.slane %v5575_v31, 4 }
  0xec   : > { %4877 = vmatprep.subr.bf16.mxu0 %v5394_v26  ;;  %v1328_v1 = vsel %vm1319_vm7, %v1325_v15, %v1327_v21  ;;  %v6585_v15 = vld [vmem:[#allocation39_spill] sm:$0xff] }
  0xed   : > { %4626 = vmatmul.mubr.msk.bf16.gmra.mrb[8].mxu1 %vm308_vm2, %v1148_v17  ;;  %v1330_v29 = vsel %vm1319_vm7, %v1327_v21, %v1329_v32  ;;  %v1500_v17 = vrot.slane %v5555_v20, 4  ;;  %v1515_v21 = vrot.slane %v5627_v60, 4 }
  0xee   : > { %4629 = vmatprep.mubr.msk.bf16.mxu1 %vm308_vm2, %v1152_v41  ;;  %v6582_v41 = vld [vmem:[#allocation11_spill] sm:$0xff] }
  0xef   : > { %4878 = vmatpush3.bf16.msra.mxu0 %v5394_v26  ;;  %v1499_v26 = vrot.slane %v5552_v19, 3  ;;  %v3343_v19 = vshll.u32 %v6578_v57, 16 }
  0xf0   : > { %5307 = vmatprep.subr.msk.bf16.mxu0 %vm333_vm0, %v5396_v47 }
  0xf1   : > { %v1501_v47 = vor.u32 %v1500_v17, %v1499_v26  ;;  %v6589_v17 = vld [vmem:[#allocation31_spill] sm:$0xff] }
  0xf2   : > { %4864 = vmatmul.mubr.msk.bf16.gmra.mrb[4].mxu0 %vm308_vm2, %v5603_v49  ;;  %v1331_v49 = vrot.slane %v5633_v62, 3 }
  0xf3   : > { %4867 = vmatprep.mubr.msk.bf16.mxu0 %vm308_vm2, %v5622_v59  ;;  %4880 = vmatpush3.bf16.msra.mxu0 %v3372_v46  ;;  %v5401_v59 = vld [vmem:[#allocation2 + $0x170] sm:$0xff]  }
  0xf4   : > { %4897 = vmatprep.subr.bf16.mxu0 %v5399_v4  ;;  %v1332_v61 = vsel %vm1319_vm7, %v1329_v32, %v1331_v49  ;;  %v6583_v46 = vld [vmem:[#allocation15_spill] sm:$0xff] }
  0xf5   : > { %4630 = vmatmul.mubr.msk.bf16.gmra.mrb[12].mxu1 %vm308_vm2, %v6577_v7  ;;  %v1511_v7 = vrot.slane %v5594_v43, 4  ;;  %v6587_v32 = vld [vmem:[#allocation23_spill] sm:$0xff] }
  0xf6   : > { %4639 = vmatprep.mubr.msk.bf16.mxu1 %vm308_vm2, %v1322_v9  ;;  %v1510_v9 = vrot.slane %v5606_v50, 3 }
  0xfa   : > { %4868 = vmatmul.mubr.msk.bf16.gmra.mrb[8].mxu0 %vm308_vm2, %v5633_v62  ;;  %v1503_v62 = vrot.slane %v6574_v10, 4  ;;  %v1506_v10 = vrot.slane %v5587_v39, 3  ;;  %v3345_v39 = vrot.slane %v3343_v19, 1 }
  0xfb   : > { %4871 = vmatprep.mubr.msk.bf16.mxu0 %vm308_vm2, %v5651_v5  ;;  %v5403_v5 = vld [vmem:[#allocation2 + $0x178] ss:$0 sps:$4 sm:$0x33]  }
  0xfc   : > { %v1504_v48 = vor.u32 %v1503_v62, %v1502_v42  ;;  %v3517_v20 = vsel %vm333_vm0, %v5403_v5, 0  ;;  %v1508_v31 = vor.u32 %v1507_v33, %v1506_v10  ;;  %v6590_v62 = vld [vmem:[#allocation32_spill] sm:$0xff]  ;;  %v6593_v10 = vld [vmem:[#allocation38_spill] sm:$0xff] }
  0xfd   : > { %4640 = vmatmul.mubr.msk.bf16.vlgmr.msra.gmra.mrb[0].mxu1 %vm308_vm2, %v1324_v2  ;;  %v1512_v2 = vor.u32 %v1511_v7, %v1510_v9  ;;  %v5410_v33 = vld [vmem:[#allocation2 + $0xbc] sm:$0xff]   ;;  %v1870_v9 = vrot.slane %v5666_v14, 1 }
  0xfe   : > { %4656 = vmatpush3.bf16.msra.mxu1 %v5395_v34  ;;  %4643 = vmatprep.mubr.msk.bf16.mxu1 %vm308_vm2, %v1326_v24  ;;  %v1334_v34 = vsel %vm1319_vm7, %v1331_v49, %v6580_v6  ;;  %v6586_v24 = vld [vmem:[#allocation29_spill] sm:$0xff]  ;;  %v1509_v43 = vsel %vm1498_vm8, %v1504_v48, %v1508_v31 }
  0xff   : > { %4657 = vmatprep.subr.bf16.mxu1 %v5398_v0  ;;  %v3346_v50 = vsel %vm229_vm1, %v6586_v24, %v3345_v39  ;;  %v1871_v7 = vor.u32 %v1870_v9, %v5663_v12  ;;  %v6599_v12 = vld [vmem:[#allocation26_spill] sm:$0xff]  ;;  %v1881_v24 = vrot.slane %v6566_v58, 1  ;;  %v6605_v58 = vld [vmem:[#allocation20_spill] sm:$0xff]  ;;  %v6619_v9 = vld [vmem:[#allocation47_spill] sm:$0xff] }
 0x102   : > { %4658 = vmatpush3.bf16.msra.mxu1 %v5398_v0  ;;  %4872 = vmatmul.mubr.msk.bf16.gmra.mrb[12].mxu0 %vm308_vm2, %v6578_v57  ;;  %v1514_v0 = vrot.slane %v5655_v8, 3 }
 0x103   : > { %5296 = vmatprep.subr.msk.bf16.mxu1 %vm333_vm0, %v5400_v36  ;;  %4881 = vmatprep.mubr.msk.bf16.mxu0 %vm308_vm2, %v6579_v52  ;;  %v1513_v36 = vsel %vm1498_vm8, %v1508_v31, %v1512_v2  ;;  %v1519_v52 = vrot.slane %v5660_v11, 4  ;;  %v1523_v11 = vrot.slane %v6556_v35, 4  ;;  %v5407_v35 = vld [vmem:[#allocation2 + $0x184] sm:$0xff]  }
 0x104   : > { %v1516_v60 = vor.u32 %v1515_v21, %v1514_v0 }
 0x105   : > { %4644 = vmatmul.mubr.msk.bf16.gmra.mrb[4].mxu1 %vm308_vm2, %v1328_v1  ;;  %v3347_v1 = vshrl.u32 %v6578_v57, 16 }
 0x106   : > { %4647 = vmatprep.mubr.msk.bf16.mxu1 %vm308_vm2, %v1330_v29  ;;  %4660 = vmatpush3.bf16.msra.mxu1 %v1576_v37  ;;  %v5404_v29 = vld [vmem:[#allocation2 + $0xa8] sm:$0xff]   ;;  %v1518_v37 = vrot.slane %v5691_v38, 3  ;;  %v1522_v38 = vrot.slane %v6555_v30, 3 }
 0x107   : > { %4677 = vmatprep.subr.bf16.mxu1 %v5402_v56  ;;  %v3349_v8 = vor.u32 %v3347_v1, %v3345_v39  ;;  %v3638_v14 = vrot.slane %v3347_v1, 1  ;;  %v6597_v39 = vld [vmem:[#allocation17_spill] sm:$0xff] }
 0x108   : > { %v1520_v49 = vor.u32 %v1519_v52, %v1518_v37  ;;  %v1524_v26 = vor.u32 %v1523_v11, %v1522_v38  ;;  %v6603_v1 = vld [vmem:[#allocation13_spill] sm:$0xff]  ;;  %v6604_v52 = vld [vmem:[#allocation42_spill] sm:$0xff] }
 0x109   : > { %v6607_v38 = vld [vmem:[#allocation21_spill] sm:$0xff] }
 0x10a   : > { %4882 = vmatmul.mubr.msk.bf16.vlgmr.msra.gmra.mrb[0].mxu0 %vm308_vm2, %v6581_v53  ;;  %v6588_v53 = vld [vmem:[#allocation30_spill] sm:$0xff]  ;;  %v1525_v30 = vsel %vm1498_vm8, %v1520_v49, %v1524_v26  ;;  %v1529_v42 = vsel %vm1498_vm8, %v1524_v26, %v6057_v40  ;;  %v6592_v40 = vld [vmem:[#allocation37_spill] sm:$0xff]  ;;  %v5417_v26 = vld [vmem:[#allocation2 + $0xd8] ss:$0 sps:$4 sm:$0x33]  }
 0x10b   : > { %4898 = vmatpush3.bf16.msra.mxu0 %v5399_v4  ;;  %4885 = vmatprep.mubr.msk.bf16.mxu0 %vm308_vm2, %v6582_v41  ;;  %v1505_v4 = vsel %vm1498_vm8, %v1501_v47, %v1504_v48  ;;  %v5409_v41 = vld [vmem:[#allocation2 + $0x18c] ss:$0 sps:$4 sm:$0x33]   ;;  %v5411_v47 = vld [vmem:[#allocation2 + $0x190] sm:$0xff]   ;;  %v6591_v48 = vld [vmem:[#allocation33_spill] sm:$0xff] }
 0x10c   : > { %4899 = vmatprep.subr.bf16.mxu0 %v5401_v59 }
 0x10d   : > { %4648 = vmatmul.mubr.msk.bf16.gmra.mrb[8].mxu1 %vm308_vm2, %v1332_v61  ;;  %v1517_v61 = vsel %vm1498_vm8, %v1512_v2, %v1516_v60  ;;  %v6598_v2 = vld [vmem:[#allocation41_spill] sm:$0xff] }
 0x10e   : > { %4651 = vmatprep.mubr.msk.bf16.mxu1 %vm308_vm2, %v1334_v34  ;;  %v5408_v34 = vld [vmem:[#allocation2 + $0xb4] sm:$0xff]  }
 0x10f   : > { %4900 = vmatpush3.bf16.msra.mxu0 %v5401_v59  ;;  %v5406_v59 = vld [vmem:[#allocation2 + $0xb0] ss:$0 sps:$4 sm:$0x33]  }
 0x110   : > { %5308 = vmatprep.subr.msk.bf16.mxu0 %vm333_vm0, %v5403_v5  ;;  %v1745_v6 = vsel %vm333_vm0, %v5406_v59, 0  ;;  %v3664_v5 = vsel %vm333_vm0, %v5409_v41, 0 }
 0x112   : > { %4886 = vmatmul.mubr.msk.bf16.gmra.mrb[4].mxu0 %vm308_vm2, %v6583_v46  ;;  %v6594_v46 = vld [vmem:[#allocation6_spill] sm:$0xff] }
 0x113   : > { %4889 = vmatprep.mubr.msk.bf16.mxu0 %vm308_vm2, %v6584_v13  ;;  %4902 = vmatpush3.bf16.msra.mxu0 %v3517_v20  ;;  %v3493_v20 = vrot.slane %v6578_v57, 1  ;;  %v6596_v13 = vld [vmem:[#allocation10_spill] sm:$0xff] }
 0x114   : > { %4919 = vmatprep.subr.bf16.mxu0 %v5405_v25 }
 0x115   : > { %4652 = vmatmul.mubr.msk.bf16.gmra.mrb[12].mxu1 %vm308_vm2, %v6585_v15  ;;  %v1874_v15 = vrot.slane %v6596_v13, 1 }
 0x116   : > { %4661 = vmatprep.mubr.msk.bf16.mxu1 %vm308_vm2, %v1505_v4  ;;  %v5413_v4 = vld [vmem:[#allocation2 + $0x198] sm:$0xff]  }
 0x117   : > { %v1875_v31 = vsel %vm229_vm1, %v1871_v7, %v1874_v15 }
 0x11a   : > { %4890 = vmatmul.mubr.msk.bf16.gmra.mrb[8].mxu0 %vm308_vm2, %v6587_v32  ;;  %v6602_v32 = vld [vmem:[#allocation18_spill] sm:$0xff] }
 0x11b   : > { %4893 = vmatprep.mubr.msk.bf16.mxu0 %vm308_vm2, %v3346_v50 }
 0x11d   : > { %4662 = vmatmul.mubr.msk.bf16.vlgmr.msra.gmra.mrb[0].mxu1 %vm308_vm2, %v1509_v43  ;;  %v6600_v43 = vld [vmem:[#allocation12_spill] sm:$0xff] }
 0x11e   : > { %4678 = vmatpush3.bf16.msra.mxu1 %v5402_v56  ;;  %4665 = vmatprep.mubr.msk.bf16.mxu1 %vm308_vm2, %v1513_v36  ;;  %v1521_v56 = vsel %vm1498_vm8, %v1516_v60, %v1520_v49  ;;  %v1878_v0 = vor.u32 %v6600_v43, %v1874_v15  ;;  %v1888_v36 = vrot.slane %v6602_v32, 1  ;;  %v6606_v49 = vld [vmem:[#allocation19_spill] sm:$0xff] }
 0x11f   : > { %4679 = vmatprep.subr.bf16.mxu1 %v5404_v29 }
 0x120   : > { %v1882_v37 = vsel %vm229_vm1, %v1878_v0, %v1881_v24 }
 0x122   : > { %4680 = vmatpush3.bf16.msra.mxu1 %v5404_v29  ;;  %4894 = vmatmul.mubr.msk.bf16.gmra.mrb[12].mxu0 %vm308_vm2, %v3349_v8  ;;  %v1895_v8 = vrot.slane %v6605_v58, 1 }
 0x123   : > { %5297 = vmatprep.subr.msk.bf16.mxu1 %vm333_vm0, %v5406_v59  ;;  %4903 = vmatprep.mubr.msk.bf16.mxu0 %vm308_vm2, %v6588_v53  ;;  %v1892_v59 = vor.u32 %v6606_v49, %v1888_v36 }
 0x124   : > { %v1899_v11 = vor.u32 %v6607_v38, %v1895_v8 }
 0x125   : > { %4666 = vmatmul.mubr.msk.bf16.gmra.mrb[4].mxu1 %vm308_vm2, %v1517_v61  ;;  %v5416_v61 = vld [vmem:[#allocation2 + $0xd0] sm:$0xff]  }
 0x126   : > { %4669 = vmatprep.mubr.msk.bf16.mxu1 %vm308_vm2, %v1521_v56  ;;  %4682 = vmatpush3.bf16.msra.mxu1 %v1745_v6  ;;  %v6608_v56 = vld [vmem:[#allocation24_spill] sm:$0xff] }
 0x127   : > { %4699 = vmatprep.subr.bf16.mxu1 %v5408_v34  ;;  %v1902_v6 = vrot.slane %v6608_v56, 1 }
 0x129   : > { %v1903_v53 = vsel %vm229_vm1, %v1899_v11, %v1902_v6 }
 0x12a   : > { %4904 = vmatmul.mubr.msk.bf16.vlgmr.msra.gmra.mrb[0].mxu0 %vm308_vm2, %v6589_v17  ;;  %v6610_v17 = vld [vmem:[#allocation25_spill] sm:$0xff] }
 0x12b   : > { %4920 = vmatpush3.bf16.msra.mxu0 %v5405_v25  ;;  %4907 = vmatprep.mubr.msk.bf16.mxu0 %vm308_vm2, %v6590_v62  ;;  %v3494_v25 = vsel %vm571_vm3, %v5913_v23, %v3493_v20  ;;  %v6595_v23 = vld [vmem:[#allocation40_spill] sm:$0xff]  ;;  %v6611_v62 = vld [vmem:[#allocation5_spill] sm:$0xff] }
 0x12c   : > { %4921 = vmatprep.subr.bf16.mxu0 %v5407_v35 }
 0x12d   : > { %4670 = vmatmul.mubr.msk.bf16.gmra.mrb[8].mxu1 %vm308_vm2, %v1525_v30  ;;  %v1909_v30 = vrot.slane %v5768_v51, 1  ;;  %v2091_v51 = vrot.slane %v5643_v3, 1 }
 0x12e   : > { %4673 = vmatprep.mubr.msk.bf16.mxu1 %vm308_vm2, %v1529_v42  ;;  %v1906_v42 = vor.u32 %v6610_v17, %v1902_v6 }
 0x12f   : > { %4922 = vmatpush3.bf16.msra.mxu0 %v5407_v35  ;;  %v6609_v35 = vld [vmem:[#allocation43_spill] sm:$0xff] }
 0x130   : > { %5309 = vmatprep.subr.msk.bf16.mxu0 %vm333_vm0, %v5409_v41  ;;  %v1913_v41 = vor.u32 %v5771_v55, %v1909_v30 }
 0x132   : > { %4908 = vmatmul.mubr.msk.bf16.gmra.mrb[4].mxu0 %vm308_vm2, %v6591_v48  ;;  %v1910_v48 = vsel %vm229_vm1, %v1906_v42, %v1909_v30 }
 0x133   : > { %4911 = vmatprep.mubr.msk.bf16.mxu0 %vm308_vm2, %v6592_v40  ;;  %4924 = vmatpush3.bf16.msra.mxu0 %v3664_v5  ;;  %v6612_v5 = vld [vmem:[#allocation27_spill] sm:$0xff]  ;;  %v6613_v40 = vld [vmem:[#allocation44_spill] sm:$0xff] }
 0x134   : > { %4941 = vmatprep.subr.bf16.mxu0 %v5411_v47 }
 0x135   : > { %4674 = vmatmul.mubr.msk.bf16.gmra.mrb[12].mxu1 %vm308_vm2, %v6071_v22  ;;  %v5412_v22 = vld [vmem:[#allocation2 + $0xc4] ss:$0 sps:$4 sm:$0x33]  }
 0x136   : > { %4683 = vmatprep.mubr.msk.bf16.mxu1 %vm308_vm2, %v5548_v18  ;;  %v1961_v18 = vsel %vm333_vm0, %v5412_v22, 0 }
 0x13a   : > { %4912 = vmatmul.mubr.msk.bf16.gmra.mrb[8].mxu0 %vm308_vm2, %v6593_v10  ;;  %v6615_v10 = vld [vmem:[#allocation28_spill] sm:$0xff] }
 0x13b   : > { %4915 = vmatprep.mubr.msk.bf16.mxu0 %vm308_vm2, %v3494_v25  ;;  %v6614_v25 = vld [vmem:[#allocation14_spill] sm:$0xff] }
 0x13d   : > { %4684 = vmatmul.mubr.msk.bf16.vlgmr.msra.gmra.mrb[0].mxu1 %vm308_vm2, %v6594_v46  ;;  %v6617_v46 = vrot.slane %v5635_v63, 1 }
 0x13e   : > { %4700 = vmatpush3.bf16.msra.mxu1 %v5408_v34  ;;  %4687 = vmatprep.mubr.msk.bf16.mxu1 %vm308_vm2, %v5570_v28  ;;  %v5415_v28 = vld [vmem:[#allocation2 + $0xc8] sm:$0xff]   ;;  %v1896_v34 = vsel %vm229_vm1, %v1892_v59, %v1895_v8 }
 0x13f   : > { %4701 = vmatprep.subr.bf16.mxu1 %v5410_v33 }
 0x142   : > { %4702 = vmatpush3.bf16.msra.mxu1 %v5410_v33  ;;  %4916 = vmatmul.mubr.msk.bf16.gmra.mrb[12].mxu0 %vm308_vm2, %v3493_v20  ;;  %v6616_v33 = vld [vmem:[#allocation45_spill] sm:$0xff] }
 0x143   : > { %5298 = vmatprep.subr.msk.bf16.mxu1 %vm333_vm0, %v5412_v22  ;;  %4925 = vmatprep.mubr.msk.bf16.mxu0 %vm308_vm2, %v6595_v23  ;;  %v2092_v22 = vsel %vm571_vm3, %v6617_v46, %v2091_v51  ;;  %v3785_v23 = vrot.slane %v6578_v57, 2 }
 0x145   : > { %4688 = vmatmul.mubr.msk.bf16.gmra.mrb[4].mxu1 %vm308_vm2, %v5597_v45  ;;  %v5414_v45 = vld [vmem:[#allocation2 + $0x1a0] ss:$0 sps:$4 sm:$0x33]  }
 0x146   : > { %4691 = vmatprep.mubr.msk.bf16.mxu1 %vm308_vm2, %v5635_v63  ;;  %4704 = vmatpush3.bf16.msra.mxu1 %v1961_v18  ;;  %v6618_v18 = vld [vmem:[#allocation46_spill] sm:$0xff] }
 0x147   : > { %4963 = vmatprep.subr.bf16.mxu1 %v5415_v28 }
 0x14a   : > { %4926 = vmatmul.mubr.msk.bf16.vlgmr.msra.gmra.mrb[0].mxu0 %vm308_vm2, %v5990_v54  ;;  %v3639_v54 = vrot.slane %v3343_v19, 2  ;;  %v6601_v19 = vld [vmem:[#allocation16_spill] sm:$0xff] }
 0x14b   : > { %4942 = vmatpush3.bf16.msra.mxu0 %v5411_v47  ;;  %4929 = vmatprep.mubr.msk.bf16.mxu0 %vm308_vm2, %v6007_v44  ;;  %v3809_v44 = vsel %vm333_vm0, %v5414_v45, 0  ;;  %v1885_v21 = vor.u32 %v6601_v19, %v1881_v24  ;;  %v1916_v47 = vrot.slane %v6612_v5, 1 }
 0x14c   : > { %4943 = vmatprep.subr.bf16.mxu0 %v5413_v4  ;;  %v3640_v50 = vor.u32 %v3639_v54, %v3638_v14 }
 0x14d   : > { %4692 = vmatmul.mubr.msk.bf16.gmra.mrb[8].mxu1 %vm308_vm2, %v5643_v3  ;;  %v1889_v60 = vsel %vm229_vm1, %v1885_v21, %v1888_v36  ;;  %v1917_v20 = vsel %vm229_vm1, %v1913_v41, %v1916_v47  ;;  %v1920_v55 = vor.u32 %v6615_v10, %v1916_v47  ;;  %v2093_v3 = vrot.slane %v5735_v27, 1 }
 0x14e   : > { %4695 = vmatprep.mubr.msk.bf16.mxu1 %vm308_vm2, %v5735_v27  ;;  %v3641_v29 = vsel %vm748_vm4, %v6603_v1, %v3640_v50 }
 0x14f   : > { %4944 = vmatpush3.bf16.msra.mxu0 %v5413_v4  ;;  %v3786_v4 = vsel %vm941_vm5, %v6125_v16, %v3785_v23  ;;  %v2094_v63 = vsel %vm571_vm3, %v2091_v51, %v2093_v3 }
 0x150   : > { %5310 = vmatprep.subr.msk.bf16.mxu0 %vm333_vm0, %v5414_v45 }
 0x152   : > { %4930 = vmatmul.mubr.msk.bf16.gmra.mrb[4].mxu0 %vm308_vm2, %v6597_v39 }
 0x153   : > { %4933 = vmatprep.mubr.msk.bf16.mxu0 %vm308_vm2, %v6598_v2  ;;  %4946 = vmatpush3.bf16.msra.mxu0 %v3809_v44 }
 0x155   : > { %4696 = vmatmul.mubr.msk.bf16.gmra.mrb[12].mxu1 %vm308_vm2, %v6599_v12 }
 0x156   : > { %4705 = vmatprep.mubr.msk.bf16.mxu1 %vm308_vm2, %v1875_v31 }
 0x15a   : > { %4934 = vmatmul.mubr.msk.bf16.gmra.mrb[8].mxu0 %vm308_vm2, %v6604_v52 }
 0x15b   : > { %4937 = vmatprep.mubr.msk.bf16.mxu0 %vm308_vm2, %v3641_v29 }
 0x15d   : > { %4706 = vmatmul.mubr.msk.bf16.vlgmr.msra.gmra.mrb[0].mxu1 %vm308_vm2, %v1882_v37 }
 0x15e   : > { %4966 = vmatpush3.bf16.msra.mxu1 %v5415_v28  ;;  %4709 = vmatprep.mubr.msk.bf16.mxu1 %vm308_vm2, %v1889_v60  ;;  %v2095_v28 = vrot.slane %v6599_v12, 1 }
 0x15f   : > { %4964 = vmatprep.subr.bf16.mxu1 %v5416_v61 }
 0x160   : > { %v2096_v45 = vsel %vm571_vm3, %v2093_v3, %v2095_v28 }
 0x162   : > { %4967 = vmatpush3.bf16.msra.mxu1 %v5416_v61  ;;  %4938 = vmatmul.mubr.msk.bf16.gmra.mrb[12].mxu0 %vm308_vm2, %v3640_v50 }
 0x163   : > { %5300 = vmatprep.subr.msk.bf16.mxu1 %vm333_vm0, %v5417_v26  ;;  %4947 = vmatprep.mubr.msk.bf16.mxu0 %vm308_vm2, %v6609_v35 }
 0x165   : > { %4710 = vmatmul.mubr.msk.bf16.gmra.mrb[4].mxu1 %vm308_vm2, %v1896_v34 }
 0x166   : > { %4713 = vmatprep.mubr.msk.bf16.mxu1 %vm308_vm2, %v1903_v53  ;;  %4968 = vmatpush3.bf16.msra.mxu1 %v6611_v62 }
 0x16a   : > { %4948 = vmatmul.mubr.msk.bf16.vlgmr.msra.gmra.mrb[0].mxu0 %vm308_vm2, %v6613_v40 }
 0x16b   : > { %4951 = vmatprep.mubr.msk.bf16.mxu0 %vm308_vm2, %v6614_v25 }
 0x16d   : > { %4714 = vmatmul.mubr.msk.bf16.gmra.mrb[8].mxu1 %vm308_vm2, %v1910_v48 }
 0x16e   : > { %4717 = vmatprep.mubr.msk.bf16.mxu1 %vm308_vm2, %v1917_v20 }
 0x172   : > { %4952 = vmatmul.mubr.msk.bf16.gmra.mrb[4].mxu0 %vm308_vm2, %v6616_v33 }
 0x173   : > { %4955 = vmatprep.mubr.msk.bf16.mxu0 %vm308_vm2, %v6618_v18 }
 0x175   : > { %4718 = vmatmul.mubr.msk.bf16.gmra.mrb[12].mxu1 %vm308_vm2, %v1920_v55 }
 0x176   : > { %4735 = vmatprep.mubr.msk.bf16.mxu1 %vm308_vm2, %v2092_v22 }
 0x17a   : > { %4956 = vmatmul.mubr.msk.bf16.gmra.mrb[8].mxu0 %vm308_vm2, %v6619_v9 }
 0x17b   : > { %4959 = vmatprep.mubr.msk.bf16.mxu0 %vm308_vm2, %v3786_v4 }
 0x17d   : > { %4736 = vmatmul.mubr.msk.bf16.vlgmr.msra.gmra.mrb[8].mxu1 %vm308_vm2, %v2094_v63 }
 0x17e   : > { %4739 = vmatprep.mubr.msk.bf16.mxu1 %vm308_vm2, %v2096_v45 }
 0x182   : > { %4960 = vmatmul.mubr.msk.bf16.gmra.mrb[12].mxu0 %vm308_vm2, %v3785_v23 }
 0x185   : > { %4740 = vmatmul.mubr.msk.bf16.gmra.mrb[12].mxu1 %vm308_vm2, %v2095_v28 }
 0x230   : > { %v4707_v27 = vpop.f32.mrb[0].mxu1 }
 0x231   : > { %v1997_v16 = vpop.f32.mrb[1].mxu1 }
 0x232   : > { %v4708_v57 = vpop.f32.mrb[2].mxu1 }
 0x233   : > { %v2000_v7 = vpop.f32.mrb[3].mxu1 }
 0x238   : > { %v4711_v13 = vpop.f32.mrb[4].mxu1 }
 0x239   : > { %v2013_v15 = vpop.f32.mrb[5].mxu1 }
 0x23a   : > { %v4712_v14 = vpop.f32.mrb[6].mxu1 }
 0x23b   : > { %v2016_v54 = vpop.f32.mrb[7].mxu1 }
 0x23d   : > { %v4949_v44 = vpop.f32.mrb[0].mxu0 }
 0x23e   : > { %v4969_v39 = vadd.f32 %v4949_v44, %v4707_v27  ;;  %v3845_v31 = vpop.f32.mrb[1].mxu0 }
 0x23f   : > { %v4970_v2 = vadd.f32 %v3845_v31, %v1997_v16  ;;  %v4950_v12 = vpop.f32.mrb[2].mxu0 }
 0x240   : > { %3926 = vst [vmem:[%s6430_s6 + $0x10] sm:$0xff] %v4969_v39  ;;  %v4971_v24 = vadd.f32 %v4950_v12, %v4708_v57  ;;  %v3848_v50 = vpop.f32.mrb[3].mxu0 }
 0x241   : > { %3924 = vst [vmem:[%s6430_s6] sm:$0xff] %v4970_v2  ;;  %v4972_v43 = vadd.f32 %v3848_v50, %v2000_v7 }
 0x242   : > { %3927 = vst [vmem:[%s6430_s6 + $0x18] sm:$0xff] %v4971_v24 }
 0x243   : > { %3925 = vst [vmem:[%s6430_s6 + $0x8] sm:$0xff] %v4972_v43 }
 0x245   : > { %v4953_v0 = vpop.f32.mrb[4].mxu0 }
 0x246   : > { %v4973_v19 = vadd.f32 %v4953_v0, %v4711_v13  ;;  %v3861_v21 = vpop.f32.mrb[5].mxu0 }
 0x247   : > { %v4974_v32 = vadd.f32 %v3861_v21, %v2013_v15  ;;  %v4954_v36 = vpop.f32.mrb[6].mxu0 }
 0x248   : > { %3930 = vst [vmem:[%s6430_s6 + $0x30] sm:$0xff] %v4973_v19  ;;  %v4975_v1 = vadd.f32 %v4954_v36, %v4712_v14  ;;  %v3864_v29 = vpop.f32.mrb[7].mxu0 }
 0x249   : > { %3928 = vst [vmem:[%s6430_s6 + $0x20] sm:$0xff] %v4974_v32  ;;  %v4976_v37 = vadd.f32 %v3864_v29, %v2016_v54 }
 0x24a   : > { %3931 = vst [vmem:[%s6430_s6 + $0x38] sm:$0xff] %v4975_v1 }
 0x24b   : > { %3929 = vst [vmem:[%s6430_s6 + $0x28] sm:$0xff] %v4976_v37 }
 0x24d   : > { %v4957_v52 = vpop.f32.mrb[8].mxu0 }
 0x24e   : > { %v3877_v60 = vpop.f32.mrb[9].mxu0 }
 0x24f   : > { %v4958_v8 = vpop.f32.mrb[10].mxu0 }
 0x250   : > { %v4737_v58 = vpop.f32.mrb[8].mxu1  ;;  %v3880_v61 = vpop.f32.mrb[11].mxu0 }
 0x251   : > { %v4977_v49 = vadd.f32 %v4957_v52, %v4737_v58  ;;  %v2205_v59 = vpop.f32.mrb[9].mxu1 }
 0x252   : > { %v4978_v38 = vadd.f32 %v3877_v60, %v2205_v59  ;;  %v4738_v11 = vpop.f32.mrb[10].mxu1 }
 0x253   : > { %3934 = vst [vmem:[%s6430_s6 + $0x50] sm:$0xff] %v4977_v49  ;;  %v4979_v56 = vadd.f32 %v4958_v8, %v4738_v11  ;;  %v2208_v6 = vpop.f32.mrb[11].mxu1 }
 0x254   : > { %3932 = vst [vmem:[%s6430_s6 + $0x40] sm:$0xff] %v4978_v38  ;;  %v4980_v34 = vadd.f32 %v3880_v61, %v2208_v6 }
 0x255   : > { %3935 = vst [vmem:[%s6430_s6 + $0x58] sm:$0xff] %v4979_v56  ;;  %v4961_v53 = vpop.f32.mrb[12].mxu0 }
 0x256   : > { %3933 = vst [vmem:[%s6430_s6 + $0x48] sm:$0xff] %v4980_v34  ;;  %v3893_v26 = vpop.f32.mrb[13].mxu0 }
 0x257   : > { %v4962_v30 = vpop.f32.mrb[14].mxu0 }
 0x258   : > { %v4741_v35 = vpop.f32.mrb[12].mxu1  ;;  %v3896_v62 = vpop.f32.mrb[15].mxu0 }
 0x259   : > { %v4981_v17 = vadd.f32 %v4961_v53, %v4741_v35  ;;  %v2221_v42 = vpop.f32.mrb[13].mxu1 }
 0x25a   : > { %v4982_v41 = vadd.f32 %v3893_v26, %v2221_v42  ;;  %v4742_v5 = vpop.f32.mrb[14].mxu1 }
 0x25b   : > { %3938 = vst [vmem:[%s6430_s6 + $0x70] sm:$0xff] %v4981_v17  ;;  %v4983_v47 = vadd.f32 %v4962_v30, %v4742_v5  ;;  %v2224_v48 = vpop.f32.mrb[15].mxu1 }
 0x25c   : > { %3936 = vst [vmem:[%s6430_s6 + $0x60] sm:$0xff] %v4982_v41  ;;  %v4984_v40 = vadd.f32 %v3896_v62, %v2224_v48 }
 0x25d   : > { %3939 = vst [vmem:[%s6430_s6 + $0x78] sm:$0xf] %v4983_v47 }
 0x25e   : > { %3937 = vst [vmem:[%s6430_s6 + $0x68] sm:$0xff] %v4984_v40 }
 0x25f PF: > { %s13_s9 = sadd.s32 1, %s5456_s9  }
 0x260   : > { %p10_p3 = scmp.ge.s32.totalorder %s13_s9, 4  }
 0x262   :  { %12 = sbr.rel (!%p10_p3) target bundleno = 1 (0x1), region = 83 }
 0x269   :  { %3961 = vsyncpa [#allocation3], 1 }
 0x26a   :  { %3963 = vsyncpa [#allocation3 + $0x1], 1 }

</bundles_post_ra>
